<compile_context>
chip_gen: v7x
topology: tpu7x:2x2x1
jax: 0.10.0
libtpu: 0.0.40
codegen_flags: <defaults>
</compile_context>

<pallas_src>
import jax
import jax.numpy as jnp
from jax.experimental import pallas as pl
from jax.experimental.pallas import tpu as pltpu

HIDDEN = 5
N_IN = 4             # 2 (position) + 2 (target)
N_HEAD = 4           # [axis0, axis1, magnitude_loc, magnitude_scale]
LEAKY_SLOPE = 0.01
TILE_B = 4096        # lanes per grid step (large tiles amortize ~0.35us/step)

# Flat SMEM parameter-slab layout (offsets into a f32[79] vector).
_W1 = 0                          # [4,5] row-major: idx = k*HIDDEN + j
_B1 = _W1 + N_IN * HIDDEN        # 20
_W2 = _B1 + HIDDEN               # 25   [5,5] row-major
_B2 = _W2 + HIDDEN * HIDDEN      # 50
_WH = _B2 + HIDDEN               # 55   [5,4] row-major (cols: a0,a1,loc,scale)
_BH = _WH + HIDDEN * N_HEAD      # 75
_NPARAMS = _BH + N_HEAD          # 79


def _leaky_relu(x):
    return jnp.where(x > 0, x, LEAKY_SLOPE * x)


def policy_kernel(w_ref, pos_ref, tgt_ref, out_ref):
    # w_ref   : f32[79] in SMEM (scalar-prefetched weight slab)
    # pos_ref : [2, TILE_B]  (features on sublanes, batch on lanes)
    # tgt_ref : [2, TILE_B]
    # out_ref : [4, TILE_B]  rows = axis_logit0, axis_logit1, loc, scale

    def norm2(a, b):
        # normalize over a 2-element feature axis == elementwise min/max of
        # two sublane rows (pure VPU, no cross-lane reduce).
        mn = jnp.minimum(a, b)
        mx = jnp.maximum(a, b)
        inv = pl.reciprocal(mx - mn + 1e-8)   # exact (approx=False) to keep
        # bit-faithful semantics vs the divide in the reference.
        return 2.0 * (a - mn) * inv - 1.0, 2.0 * (b - mn) * inv - 1.0

    px = pos_ref[0:1, :]
    py = pos_ref[1:2, :]
    tx = tgt_ref[0:1, :]
    ty = tgt_ref[1:2, :]

    x0, x1 = norm2(px, py)
    x2, x3 = norm2(tx, ty)
    xs = (x0, x1, x2, x3)

    # Hidden layer 1: unrolled scalar-broadcast FMAs on the VPU (K=4, N=5 is
    # far too small for the MXU).
    h1 = []
    for j in range(HIDDEN):
        acc = xs[0] * w_ref[_W1 + 0 * HIDDEN + j]
        for k in range(1, N_IN):
            acc = acc + xs[k] * w_ref[_W1 + k * HIDDEN + j]
        acc = acc + w_ref[_B1 + j]
        h1.append(_leaky_relu(acc))

    # Hidden layer 2 (K=5, N=5).
    h2 = []
    for j in range(HIDDEN):
        acc = h1[0] * w_ref[_W2 + 0 * HIDDEN + j]
        for k in range(1, HIDDEN):
            acc = acc + h1[k] * w_ref[_W2 + k * HIDDEN + j]
        acc = acc + w_ref[_B2 + j]
        h2.append(_leaky_relu(acc))

    # Fused output heads (K=5, N=4): cols 0,1 axis logits; 2 loc; 3 scale.
    heads = []
    for j in range(N_HEAD):
        acc = h2[0] * w_ref[_WH + 0 * N_HEAD + j]
        for k in range(1, HIDDEN):
            acc = acc + h2[k] * w_ref[_WH + k * N_HEAD + j]
        acc = acc + w_ref[_BH + j]
        heads.append(acc)

    loc = jnp.tanh(heads[2])                                       # EUP
    scale = jnp.clip(jax.nn.softplus(heads[3]) + 1e-5, 1e-5, 2.0)  # EUP + VPU

    # Single packed, lane-dense store.
    out_ref[...] = jnp.concatenate([heads[0], heads[1], loc, scale], axis=0)


@jax.jit
def policy_forward(position, target, params):
    B = position.shape[0]
    n_tiles = -(-B // TILE_B)
    Bp = n_tiles * TILE_B

    # Layout plumbing (transpose + pad to a lane multiple) done in the wrapper.
    pos_t = jnp.pad(position.astype(jnp.float32).T, ((0, 0), (0, Bp - B)))
    tgt_t = jnp.pad(target.astype(jnp.float32).T, ((0, 0), (0, Bp - B)))

    # Pack all weights/biases into one flat f32 slab (SMEM via scalar prefetch).
    w_head = jnp.concatenate([params["wa"], params["wm"]], axis=1)   # [5, 4]
    b_head = jnp.concatenate([params["ba"], params["bm"]])           # [4]
    w_flat = jnp.concatenate([
        params["w1"].reshape(-1), params["b1"],
        params["w2"].reshape(-1), params["b2"],
        w_head.reshape(-1), b_head,
    ]).astype(jnp.float32)                                           # [79]

    out = pl.pallas_call(
        policy_kernel,
        out_shape=jax.ShapeDtypeStruct((N_HEAD, Bp), jnp.float32),
        grid_spec=pltpu.PrefetchScalarGridSpec(
            num_scalar_prefetch=1,
            grid=(n_tiles,),
            in_specs=[
                pl.BlockSpec((2, TILE_B), lambda i, w: (0, i)),
                pl.BlockSpec((2, TILE_B), lambda i, w: (0, i)),
            ],
            out_specs=pl.BlockSpec((N_HEAD, TILE_B), lambda i, w: (0, i)),
        ),
        compiler_params=pltpu.CompilerParams(
            dimension_semantics=("parallel",)),
    )(w_flat, pos_t, tgt_t)

    axis_logits = out[0:2, :B].T       # [B, 2]
    loc = out[2, :B]                   # [B]
    scale = out[3, :B]                 # [B]

    # TODO(synk): TensorDict / torch.distributions have no Pallas equivalent;
    # return the distribution parameters as a plain nested dict.
    return {
        "params": {
            "axis": {"logits": axis_logits},
            "magnitude": {"loc": loc, "scale": scale},
        }
    }


def init_params(key):
    """Deterministic init matching nn.Linear + xavier_uniform_ on weights."""
    def xavier(key, fan_in, fan_out):
        bound = (6.0 / (fan_in + fan_out)) ** 0.5
        # stored as [in, out] so forward does x @ W (== x @ W_torch^T)
        return jax.random.uniform(key, (fan_in, fan_out), jnp.float32,
                                  -bound, bound)

    def bias(key, fan_in, fan_out):
        bound = 1.0 / (fan_in ** 0.5)
        return jax.random.uniform(key, (fan_out,), jnp.float32, -bound, bound)

    ks = jax.random.split(key, 8)
    return {
        "w1": xavier(ks[0], N_IN, HIDDEN), "b1": bias(ks[1], N_IN, HIDDEN),
        "w2": xavier(ks[2], HIDDEN, HIDDEN), "b2": bias(ks[3], HIDDEN, HIDDEN),
        "wa": xavier(ks[4], HIDDEN, 2), "ba": bias(ks[5], HIDDEN, 2),
        "wm": xavier(ks[6], HIDDEN, 2), "bm": bias(ks[7], HIDDEN, 2),
    }


def _normalize_ref(x):
    mn = jnp.min(x, axis=-1, keepdims=True)
    mx = jnp.max(x, axis=-1, keepdims=True)
    return 2.0 * (x - mn) / (mx - mn + 1e-8) - 1.0


def policy_forward_ref(position, target, params):
    """Pure-JAX reference for correctness checking."""
    x = jnp.concatenate([_normalize_ref(position), _normalize_ref(target)], -1)
    h = _leaky_relu(x @ params["w1"] + params["b1"])
    h = _leaky_relu(h @ params["w2"] + params["b2"])
    axis_logits = h @ params["wa"] + params["ba"]
    mag = h @ params["wm"] + params["bm"]
    loc = jnp.tanh(mag[..., 0])
    scale = jnp.clip(jax.nn.softplus(mag[..., 1]) + 1e-5, 1e-5, 2.0)
    return axis_logits, loc, scale


if __name__ == "__main__":
    key = jax.random.PRNGKey(0)
    k_par, k_pos, k_tgt = jax.random.split(key, 3)

    params = init_params(k_par)
    batch = 8
    position = jax.random.uniform(k_pos, (batch, 2), jnp.float32, 0.0, 10.0)
    target = jax.random.uniform(k_tgt, (batch, 2), jnp.float32, 0.0, 10.0)

    out = policy_forward(position, target, params)
    jax.block_until_ready(out)

    ref_logits, ref_loc, ref_scale = policy_forward_ref(position, target, params)
    assert jnp.allclose(out["params"]["axis"]["logits"], ref_logits,
                        rtol=1e-5, atol=1e-5)
    assert jnp.allclose(out["params"]["magnitude"]["loc"], ref_loc,
                        rtol=1e-5, atol=1e-5)
    assert jnp.allclose(out["params"]["magnitude"]["scale"], ref_scale,
                        rtol=1e-5, atol=1e-5)

    print("KERNEL_OK")
</pallas_src>

<mosaic_0001>
module attributes {stable_mosaic.version = 11 : i64} {
  func.func @policy_kernel(%arg0: i32, %arg1: memref<79xf32, #tpu.memory_space<smem>>, %arg2: memref<2x4096xf32, #tpu.memory_space<vmem>>, %arg3: memref<2x4096xf32, #tpu.memory_space<vmem>>, %arg4: memref<4x4096xf32, #tpu.memory_space<vmem>>) attributes {dimension_semantics = [#tpu.dimension_semantics<parallel>], iteration_bounds = array<i64: 1>, scalar_prefetch = 1 : i64, scratch_operands = 0 : i64, tpu.core_type = #tpu.core_type<tc>, window_params = [{transform_indices = @transform_0, window_bounds = array<i64: 2, 4096>}, {transform_indices = @transform_1, window_bounds = array<i64: 2, 4096>}, {transform_indices = @transform_2, window_bounds = array<i64: 4, 4096>}]} {
    %c0 = arith.constant 0 : index
    %c0_0 = arith.constant 0 : index
    %0 = vector.load %arg2[%c0, %c0_0] : memref<2x4096xf32, #tpu.memory_space<vmem>>, vector<1x4096xf32>
    %c1 = arith.constant 1 : index
    %c0_1 = arith.constant 0 : index
    %1 = vector.load %arg2[%c1, %c0_1] : memref<2x4096xf32, #tpu.memory_space<vmem>>, vector<1x4096xf32>
    %c0_2 = arith.constant 0 : index
    %c0_3 = arith.constant 0 : index
    %2 = vector.load %arg3[%c0_2, %c0_3] : memref<2x4096xf32, #tpu.memory_space<vmem>>, vector<1x4096xf32>
    %c1_4 = arith.constant 1 : index
    %c0_5 = arith.constant 0 : index
    %3 = vector.load %arg3[%c1_4, %c0_5] : memref<2x4096xf32, #tpu.memory_space<vmem>>, vector<1x4096xf32>
    %4 = arith.minimumf %0, %1 : vector<1x4096xf32>
    %5 = arith.maximumf %0, %1 : vector<1x4096xf32>
    %6 = arith.subf %5, %4 : vector<1x4096xf32>
    %cst = arith.constant 9.99999993E-9 : f32
    %7 = vector.broadcast %cst : f32 to vector<1x4096xf32>
    %8 = arith.addf %6, %7 : vector<1x4096xf32>
    %9 = tpu.reciprocal %8 : vector<1x4096xf32> -> vector<1x4096xf32>
    %10 = arith.subf %0, %4 : vector<1x4096xf32>
    %cst_6 = arith.constant 2.000000e+00 : f32
    %11 = vector.broadcast %cst_6 : f32 to vector<1x4096xf32>
    %12 = arith.mulf %11, %10 : vector<1x4096xf32>
    %13 = arith.mulf %12, %9 : vector<1x4096xf32>
    %cst_7 = arith.constant 1.000000e+00 : f32
    %14 = vector.broadcast %cst_7 : f32 to vector<1x4096xf32>
    %15 = arith.subf %13, %14 : vector<1x4096xf32>
    %16 = arith.subf %1, %4 : vector<1x4096xf32>
    %cst_8 = arith.constant 2.000000e+00 : f32
    %17 = vector.broadcast %cst_8 : f32 to vector<1x4096xf32>
    %18 = arith.mulf %17, %16 : vector<1x4096xf32>
    %19 = arith.mulf %18, %9 : vector<1x4096xf32>
    %cst_9 = arith.constant 1.000000e+00 : f32
    %20 = vector.broadcast %cst_9 : f32 to vector<1x4096xf32>
    %21 = arith.subf %19, %20 : vector<1x4096xf32>
    %22 = arith.minimumf %2, %3 : vector<1x4096xf32>
    %23 = arith.maximumf %2, %3 : vector<1x4096xf32>
    %24 = arith.subf %23, %22 : vector<1x4096xf32>
    %cst_10 = arith.constant 9.99999993E-9 : f32
    %25 = vector.broadcast %cst_10 : f32 to vector<1x4096xf32>
    %26 = arith.addf %24, %25 : vector<1x4096xf32>
    %27 = tpu.reciprocal %26 : vector<1x4096xf32> -> vector<1x4096xf32>
    %28 = arith.subf %2, %22 : vector<1x4096xf32>
    %cst_11 = arith.constant 2.000000e+00 : f32
    %29 = vector.broadcast %cst_11 : f32 to vector<1x4096xf32>
    %30 = arith.mulf %29, %28 : vector<1x4096xf32>
    %31 = arith.mulf %30, %27 : vector<1x4096xf32>
    %cst_12 = arith.constant 1.000000e+00 : f32
    %32 = vector.broadcast %cst_12 : f32 to vector<1x4096xf32>
    %33 = arith.subf %31, %32 : vector<1x4096xf32>
    %34 = arith.subf %3, %22 : vector<1x4096xf32>
    %cst_13 = arith.constant 2.000000e+00 : f32
    %35 = vector.broadcast %cst_13 : f32 to vector<1x4096xf32>
    %36 = arith.mulf %35, %34 : vector<1x4096xf32>
    %37 = arith.mulf %36, %27 : vector<1x4096xf32>
    %cst_14 = arith.constant 1.000000e+00 : f32
    %38 = vector.broadcast %cst_14 : f32 to vector<1x4096xf32>
    %39 = arith.subf %37, %38 : vector<1x4096xf32>
    %c0_15 = arith.constant 0 : index
    %40 = memref.load %arg1[%c0_15] : memref<79xf32, #tpu.memory_space<smem>>
    %41 = vector.broadcast %40 : f32 to vector<1x4096xf32>
    %42 = arith.mulf %15, %41 : vector<1x4096xf32>
    %c5 = arith.constant 5 : index
    %43 = memref.load %arg1[%c5] : memref<79xf32, #tpu.memory_space<smem>>
    %44 = vector.broadcast %43 : f32 to vector<1x4096xf32>
    %45 = arith.mulf %21, %44 : vector<1x4096xf32>
    %46 = arith.addf %42, %45 : vector<1x4096xf32>
    %c10 = arith.constant 10 : index
    %47 = memref.load %arg1[%c10] : memref<79xf32, #tpu.memory_space<smem>>
    %48 = vector.broadcast %47 : f32 to vector<1x4096xf32>
    %49 = arith.mulf %33, %48 : vector<1x4096xf32>
    %50 = arith.addf %46, %49 : vector<1x4096xf32>
    %c15 = arith.constant 15 : index
    %51 = memref.load %arg1[%c15] : memref<79xf32, #tpu.memory_space<smem>>
    %52 = vector.broadcast %51 : f32 to vector<1x4096xf32>
    %53 = arith.mulf %39, %52 : vector<1x4096xf32>
    %54 = arith.addf %50, %53 : vector<1x4096xf32>
    %c20 = arith.constant 20 : index
    %55 = memref.load %arg1[%c20] : memref<79xf32, #tpu.memory_space<smem>>
    %56 = vector.broadcast %55 : f32 to vector<1x4096xf32>
    %57 = arith.addf %54, %56 : vector<1x4096xf32>
    %cst_16 = arith.constant 0.000000e+00 : f32
    %58 = vector.broadcast %cst_16 : f32 to vector<1x4096xf32>
    %59 = arith.cmpf ogt, %57, %58 : vector<1x4096xf32>
    %cst_17 = arith.constant 0.00999999977 : f32
    %60 = vector.broadcast %cst_17 : f32 to vector<1x4096xf32>
    %61 = arith.mulf %60, %57 : vector<1x4096xf32>
    %62 = arith.select %59, %57, %61 : vector<1x4096xi1>, vector<1x4096xf32>
    %c1_18 = arith.constant 1 : index
    %63 = memref.load %arg1[%c1_18] : memref<79xf32, #tpu.memory_space<smem>>
    %64 = vector.broadcast %63 : f32 to vector<1x4096xf32>
    %65 = arith.mulf %15, %64 : vector<1x4096xf32>
    %c6 = arith.constant 6 : index
    %66 = memref.load %arg1[%c6] : memref<79xf32, #tpu.memory_space<smem>>
    %67 = vector.broadcast %66 : f32 to vector<1x4096xf32>
    %68 = arith.mulf %21, %67 : vector<1x4096xf32>
    %69 = arith.addf %65, %68 : vector<1x4096xf32>
    %c11 = arith.constant 11 : index
    %70 = memref.load %arg1[%c11] : memref<79xf32, #tpu.memory_space<smem>>
    %71 = vector.broadcast %70 : f32 to vector<1x4096xf32>
    %72 = arith.mulf %33, %71 : vector<1x4096xf32>
    %73 = arith.addf %69, %72 : vector<1x4096xf32>
    %c16 = arith.constant 16 : index
    %74 = memref.load %arg1[%c16] : memref<79xf32, #tpu.memory_space<smem>>
    %75 = vector.broadcast %74 : f32 to vector<1x4096xf32>
    %76 = arith.mulf %39, %75 : vector<1x4096xf32>
    %77 = arith.addf %73, %76 : vector<1x4096xf32>
    %c21 = arith.constant 21 : index
    %78 = memref.load %arg1[%c21] : memref<79xf32, #tpu.memory_space<smem>>
    %79 = vector.broadcast %78 : f32 to vector<1x4096xf32>
    %80 = arith.addf %77, %79 : vector<1x4096xf32>
    %cst_19 = arith.constant 0.000000e+00 : f32
    %81 = vector.broadcast %cst_19 : f32 to vector<1x4096xf32>
    %82 = arith.cmpf ogt, %80, %81 : vector<1x4096xf32>
    %cst_20 = arith.constant 0.00999999977 : f32
    %83 = vector.broadcast %cst_20 : f32 to vector<1x4096xf32>
    %84 = arith.mulf %83, %80 : vector<1x4096xf32>
    %85 = arith.select %82, %80, %84 : vector<1x4096xi1>, vector<1x4096xf32>
    %c2 = arith.constant 2 : index
    %86 = memref.load %arg1[%c2] : memref<79xf32, #tpu.memory_space<smem>>
    %87 = vector.broadcast %86 : f32 to vector<1x4096xf32>
    %88 = arith.mulf %15, %87 : vector<1x4096xf32>
    %c7 = arith.constant 7 : index
    %89 = memref.load %arg1[%c7] : memref<79xf32, #tpu.memory_space<smem>>
    %90 = vector.broadcast %89 : f32 to vector<1x4096xf32>
    %91 = arith.mulf %21, %90 : vector<1x4096xf32>
    %92 = arith.addf %88, %91 : vector<1x4096xf32>
    %c12 = arith.constant 12 : index
    %93 = memref.load %arg1[%c12] : memref<79xf32, #tpu.memory_space<smem>>
    %94 = vector.broadcast %93 : f32 to vector<1x4096xf32>
    %95 = arith.mulf %33, %94 : vector<1x4096xf32>
    %96 = arith.addf %92, %95 : vector<1x4096xf32>
    %c17 = arith.constant 17 : index
    %97 = memref.load %arg1[%c17] : memref<79xf32, #tpu.memory_space<smem>>
    %98 = vector.broadcast %97 : f32 to vector<1x4096xf32>
    %99 = arith.mulf %39, %98 : vector<1x4096xf32>
    %100 = arith.addf %96, %99 : vector<1x4096xf32>
    %c22 = arith.constant 22 : index
    %101 = memref.load %arg1[%c22] : memref<79xf32, #tpu.memory_space<smem>>
    %102 = vector.broadcast %101 : f32 to vector<1x4096xf32>
    %103 = arith.addf %100, %102 : vector<1x4096xf32>
    %cst_21 = arith.constant 0.000000e+00 : f32
    %104 = vector.broadcast %cst_21 : f32 to vector<1x4096xf32>
    %105 = arith.cmpf ogt, %103, %104 : vector<1x4096xf32>
    %cst_22 = arith.constant 0.00999999977 : f32
    %106 = vector.broadcast %cst_22 : f32 to vector<1x4096xf32>
    %107 = arith.mulf %106, %103 : vector<1x4096xf32>
    %108 = arith.select %105, %103, %107 : vector<1x4096xi1>, vector<1x4096xf32>
    %c3 = arith.constant 3 : index
    %109 = memref.load %arg1[%c3] : memref<79xf32, #tpu.memory_space<smem>>
    %110 = vector.broadcast %109 : f32 to vector<1x4096xf32>
    %111 = arith.mulf %15, %110 : vector<1x4096xf32>
    %c8 = arith.constant 8 : index
    %112 = memref.load %arg1[%c8] : memref<79xf32, #tpu.memory_space<smem>>
    %113 = vector.broadcast %112 : f32 to vector<1x4096xf32>
    %114 = arith.mulf %21, %113 : vector<1x4096xf32>
    %115 = arith.addf %111, %114 : vector<1x4096xf32>
    %c13 = arith.constant 13 : index
    %116 = memref.load %arg1[%c13] : memref<79xf32, #tpu.memory_space<smem>>
    %117 = vector.broadcast %116 : f32 to vector<1x4096xf32>
    %118 = arith.mulf %33, %117 : vector<1x4096xf32>
    %119 = arith.addf %115, %118 : vector<1x4096xf32>
    %c18 = arith.constant 18 : index
    %120 = memref.load %arg1[%c18] : memref<79xf32, #tpu.memory_space<smem>>
    %121 = vector.broadcast %120 : f32 to vector<1x4096xf32>
    %122 = arith.mulf %39, %121 : vector<1x4096xf32>
    %123 = arith.addf %119, %122 : vector<1x4096xf32>
    %c23 = arith.constant 23 : index
    %124 = memref.load %arg1[%c23] : memref<79xf32, #tpu.memory_space<smem>>
    %125 = vector.broadcast %124 : f32 to vector<1x4096xf32>
    %126 = arith.addf %123, %125 : vector<1x4096xf32>
    %cst_23 = arith.constant 0.000000e+00 : f32
    %127 = vector.broadcast %cst_23 : f32 to vector<1x4096xf32>
    %128 = arith.cmpf ogt, %126, %127 : vector<1x4096xf32>
    %cst_24 = arith.constant 0.00999999977 : f32
    %129 = vector.broadcast %cst_24 : f32 to vector<1x4096xf32>
    %130 = arith.mulf %129, %126 : vector<1x4096xf32>
    %131 = arith.select %128, %126, %130 : vector<1x4096xi1>, vector<1x4096xf32>
    %c4 = arith.constant 4 : index
    %132 = memref.load %arg1[%c4] : memref<79xf32, #tpu.memory_space<smem>>
    %133 = vector.broadcast %132 : f32 to vector<1x4096xf32>
    %134 = arith.mulf %15, %133 : vector<1x4096xf32>
    %c9 = arith.constant 9 : index
    %135 = memref.load %arg1[%c9] : memref<79xf32, #tpu.memory_space<smem>>
    %136 = vector.broadcast %135 : f32 to vector<1x4096xf32>
    %137 = arith.mulf %21, %136 : vector<1x4096xf32>
    %138 = arith.addf %134, %137 : vector<1x4096xf32>
    %c14 = arith.constant 14 : index
    %139 = memref.load %arg1[%c14] : memref<79xf32, #tpu.memory_space<smem>>
    %140 = vector.broadcast %139 : f32 to vector<1x4096xf32>
    %141 = arith.mulf %33, %140 : vector<1x4096xf32>
    %142 = arith.addf %138, %141 : vector<1x4096xf32>
    %c19 = arith.constant 19 : index
    %143 = memref.load %arg1[%c19] : memref<79xf32, #tpu.memory_space<smem>>
    %144 = vector.broadcast %143 : f32 to vector<1x4096xf32>
    %145 = arith.mulf %39, %144 : vector<1x4096xf32>
    %146 = arith.addf %142, %145 : vector<1x4096xf32>
    %c24 = arith.constant 24 : index
    %147 = memref.load %arg1[%c24] : memref<79xf32, #tpu.memory_space<smem>>
    %148 = vector.broadcast %147 : f32 to vector<1x4096xf32>
    %149 = arith.addf %146, %148 : vector<1x4096xf32>
    %cst_25 = arith.constant 0.000000e+00 : f32
    %150 = vector.broadcast %cst_25 : f32 to vector<1x4096xf32>
    %151 = arith.cmpf ogt, %149, %150 : vector<1x4096xf32>
    %cst_26 = arith.constant 0.00999999977 : f32
    %152 = vector.broadcast %cst_26 : f32 to vector<1x4096xf32>
    %153 = arith.mulf %152, %149 : vector<1x4096xf32>
    %154 = arith.select %151, %149, %153 : vector<1x4096xi1>, vector<1x4096xf32>
    %c25 = arith.constant 25 : index
    %155 = memref.load %arg1[%c25] : memref<79xf32, #tpu.memory_space<smem>>
    %156 = vector.broadcast %155 : f32 to vector<1x4096xf32>
    %157 = arith.mulf %62, %156 : vector<1x4096xf32>
    %c30 = arith.constant 30 : index
    %158 = memref.load %arg1[%c30] : memref<79xf32, #tpu.memory_space<smem>>
    %159 = vector.broadcast %158 : f32 to vector<1x4096xf32>
    %160 = arith.mulf %85, %159 : vector<1x4096xf32>
    %161 = arith.addf %157, %160 : vector<1x4096xf32>
    %c35 = arith.constant 35 : index
    %162 = memref.load %arg1[%c35] : memref<79xf32, #tpu.memory_space<smem>>
    %163 = vector.broadcast %162 : f32 to vector<1x4096xf32>
    %164 = arith.mulf %108, %163 : vector<1x4096xf32>
    %165 = arith.addf %161, %164 : vector<1x4096xf32>
    %c40 = arith.constant 40 : index
    %166 = memref.load %arg1[%c40] : memref<79xf32, #tpu.memory_space<smem>>
    %167 = vector.broadcast %166 : f32 to vector<1x4096xf32>
    %168 = arith.mulf %131, %167 : vector<1x4096xf32>
    %169 = arith.addf %165, %168 : vector<1x4096xf32>
    %c45 = arith.constant 45 : index
    %170 = memref.load %arg1[%c45] : memref<79xf32, #tpu.memory_space<smem>>
    %171 = vector.broadcast %170 : f32 to vector<1x4096xf32>
    %172 = arith.mulf %154, %171 : vector<1x4096xf32>
    %173 = arith.addf %169, %172 : vector<1x4096xf32>
    %c50 = arith.constant 50 : index
    %174 = memref.load %arg1[%c50] : memref<79xf32, #tpu.memory_space<smem>>
    %175 = vector.broadcast %174 : f32 to vector<1x4096xf32>
    %176 = arith.addf %173, %175 : vector<1x4096xf32>
    %cst_27 = arith.constant 0.000000e+00 : f32
    %177 = vector.broadcast %cst_27 : f32 to vector<1x4096xf32>
    %178 = arith.cmpf ogt, %176, %177 : vector<1x4096xf32>
    %cst_28 = arith.constant 0.00999999977 : f32
    %179 = vector.broadcast %cst_28 : f32 to vector<1x4096xf32>
    %180 = arith.mulf %179, %176 : vector<1x4096xf32>
    %181 = arith.select %178, %176, %180 : vector<1x4096xi1>, vector<1x4096xf32>
    %c26 = arith.constant 26 : index
    %182 = memref.load %arg1[%c26] : memref<79xf32, #tpu.memory_space<smem>>
    %183 = vector.broadcast %182 : f32 to vector<1x4096xf32>
    %184 = arith.mulf %62, %183 : vector<1x4096xf32>
    %c31 = arith.constant 31 : index
    %185 = memref.load %arg1[%c31] : memref<79xf32, #tpu.memory_space<smem>>
    %186 = vector.broadcast %185 : f32 to vector<1x4096xf32>
    %187 = arith.mulf %85, %186 : vector<1x4096xf32>
    %188 = arith.addf %184, %187 : vector<1x4096xf32>
    %c36 = arith.constant 36 : index
    %189 = memref.load %arg1[%c36] : memref<79xf32, #tpu.memory_space<smem>>
    %190 = vector.broadcast %189 : f32 to vector<1x4096xf32>
    %191 = arith.mulf %108, %190 : vector<1x4096xf32>
    %192 = arith.addf %188, %191 : vector<1x4096xf32>
    %c41 = arith.constant 41 : index
    %193 = memref.load %arg1[%c41] : memref<79xf32, #tpu.memory_space<smem>>
    %194 = vector.broadcast %193 : f32 to vector<1x4096xf32>
    %195 = arith.mulf %131, %194 : vector<1x4096xf32>
    %196 = arith.addf %192, %195 : vector<1x4096xf32>
    %c46 = arith.constant 46 : index
    %197 = memref.load %arg1[%c46] : memref<79xf32, #tpu.memory_space<smem>>
    %198 = vector.broadcast %197 : f32 to vector<1x4096xf32>
    %199 = arith.mulf %154, %198 : vector<1x4096xf32>
    %200 = arith.addf %196, %199 : vector<1x4096xf32>
    %c51 = arith.constant 51 : index
    %201 = memref.load %arg1[%c51] : memref<79xf32, #tpu.memory_space<smem>>
    %202 = vector.broadcast %201 : f32 to vector<1x4096xf32>
    %203 = arith.addf %200, %202 : vector<1x4096xf32>
    %cst_29 = arith.constant 0.000000e+00 : f32
    %204 = vector.broadcast %cst_29 : f32 to vector<1x4096xf32>
    %205 = arith.cmpf ogt, %203, %204 : vector<1x4096xf32>
    %cst_30 = arith.constant 0.00999999977 : f32
    %206 = vector.broadcast %cst_30 : f32 to vector<1x4096xf32>
    %207 = arith.mulf %206, %203 : vector<1x4096xf32>
    %208 = arith.select %205, %203, %207 : vector<1x4096xi1>, vector<1x4096xf32>
    %c27 = arith.constant 27 : index
    %209 = memref.load %arg1[%c27] : memref<79xf32, #tpu.memory_space<smem>>
    %210 = vector.broadcast %209 : f32 to vector<1x4096xf32>
    %211 = arith.mulf %62, %210 : vector<1x4096xf32>
    %c32 = arith.constant 32 : index
    %212 = memref.load %arg1[%c32] : memref<79xf32, #tpu.memory_space<smem>>
    %213 = vector.broadcast %212 : f32 to vector<1x4096xf32>
    %214 = arith.mulf %85, %213 : vector<1x4096xf32>
    %215 = arith.addf %211, %214 : vector<1x4096xf32>
    %c37 = arith.constant 37 : index
    %216 = memref.load %arg1[%c37] : memref<79xf32, #tpu.memory_space<smem>>
    %217 = vector.broadcast %216 : f32 to vector<1x4096xf32>
    %218 = arith.mulf %108, %217 : vector<1x4096xf32>
    %219 = arith.addf %215, %218 : vector<1x4096xf32>
    %c42 = arith.constant 42 : index
    %220 = memref.load %arg1[%c42] : memref<79xf32, #tpu.memory_space<smem>>
    %221 = vector.broadcast %220 : f32 to vector<1x4096xf32>
    %222 = arith.mulf %131, %221 : vector<1x4096xf32>
    %223 = arith.addf %219, %222 : vector<1x4096xf32>
    %c47 = arith.constant 47 : index
    %224 = memref.load %arg1[%c47] : memref<79xf32, #tpu.memory_space<smem>>
    %225 = vector.broadcast %224 : f32 to vector<1x4096xf32>
    %226 = arith.mulf %154, %225 : vector<1x4096xf32>
    %227 = arith.addf %223, %226 : vector<1x4096xf32>
    %c52 = arith.constant 52 : index
    %228 = memref.load %arg1[%c52] : memref<79xf32, #tpu.memory_space<smem>>
    %229 = vector.broadcast %228 : f32 to vector<1x4096xf32>
    %230 = arith.addf %227, %229 : vector<1x4096xf32>
    %cst_31 = arith.constant 0.000000e+00 : f32
    %231 = vector.broadcast %cst_31 : f32 to vector<1x4096xf32>
    %232 = arith.cmpf ogt, %230, %231 : vector<1x4096xf32>
    %cst_32 = arith.constant 0.00999999977 : f32
    %233 = vector.broadcast %cst_32 : f32 to vector<1x4096xf32>
    %234 = arith.mulf %233, %230 : vector<1x4096xf32>
    %235 = arith.select %232, %230, %234 : vector<1x4096xi1>, vector<1x4096xf32>
    %c28 = arith.constant 28 : index
    %236 = memref.load %arg1[%c28] : memref<79xf32, #tpu.memory_space<smem>>
    %237 = vector.broadcast %236 : f32 to vector<1x4096xf32>
    %238 = arith.mulf %62, %237 : vector<1x4096xf32>
    %c33 = arith.constant 33 : index
    %239 = memref.load %arg1[%c33] : memref<79xf32, #tpu.memory_space<smem>>
    %240 = vector.broadcast %239 : f32 to vector<1x4096xf32>
    %241 = arith.mulf %85, %240 : vector<1x4096xf32>
    %242 = arith.addf %238, %241 : vector<1x4096xf32>
    %c38 = arith.constant 38 : index
    %243 = memref.load %arg1[%c38] : memref<79xf32, #tpu.memory_space<smem>>
    %244 = vector.broadcast %243 : f32 to vector<1x4096xf32>
    %245 = arith.mulf %108, %244 : vector<1x4096xf32>
    %246 = arith.addf %242, %245 : vector<1x4096xf32>
    %c43 = arith.constant 43 : index
    %247 = memref.load %arg1[%c43] : memref<79xf32, #tpu.memory_space<smem>>
    %248 = vector.broadcast %247 : f32 to vector<1x4096xf32>
    %249 = arith.mulf %131, %248 : vector<1x4096xf32>
    %250 = arith.addf %246, %249 : vector<1x4096xf32>
    %c48 = arith.constant 48 : index
    %251 = memref.load %arg1[%c48] : memref<79xf32, #tpu.memory_space<smem>>
    %252 = vector.broadcast %251 : f32 to vector<1x4096xf32>
    %253 = arith.mulf %154, %252 : vector<1x4096xf32>
    %254 = arith.addf %250, %253 : vector<1x4096xf32>
    %c53 = arith.constant 53 : index
    %255 = memref.load %arg1[%c53] : memref<79xf32, #tpu.memory_space<smem>>
    %256 = vector.broadcast %255 : f32 to vector<1x4096xf32>
    %257 = arith.addf %254, %256 : vector<1x4096xf32>
    %cst_33 = arith.constant 0.000000e+00 : f32
    %258 = vector.broadcast %cst_33 : f32 to vector<1x4096xf32>
    %259 = arith.cmpf ogt, %257, %258 : vector<1x4096xf32>
    %cst_34 = arith.constant 0.00999999977 : f32
    %260 = vector.broadcast %cst_34 : f32 to vector<1x4096xf32>
    %261 = arith.mulf %260, %257 : vector<1x4096xf32>
    %262 = arith.select %259, %257, %261 : vector<1x4096xi1>, vector<1x4096xf32>
    %c29 = arith.constant 29 : index
    %263 = memref.load %arg1[%c29] : memref<79xf32, #tpu.memory_space<smem>>
    %264 = vector.broadcast %263 : f32 to vector<1x4096xf32>
    %265 = arith.mulf %62, %264 : vector<1x4096xf32>
    %c34 = arith.constant 34 : index
    %266 = memref.load %arg1[%c34] : memref<79xf32, #tpu.memory_space<smem>>
    %267 = vector.broadcast %266 : f32 to vector<1x4096xf32>
    %268 = arith.mulf %85, %267 : vector<1x4096xf32>
    %269 = arith.addf %265, %268 : vector<1x4096xf32>
    %c39 = arith.constant 39 : index
    %270 = memref.load %arg1[%c39] : memref<79xf32, #tpu.memory_space<smem>>
    %271 = vector.broadcast %270 : f32 to vector<1x4096xf32>
    %272 = arith.mulf %108, %271 : vector<1x4096xf32>
    %273 = arith.addf %269, %272 : vector<1x4096xf32>
    %c44 = arith.constant 44 : index
    %274 = memref.load %arg1[%c44] : memref<79xf32, #tpu.memory_space<smem>>
    %275 = vector.broadcast %274 : f32 to vector<1x4096xf32>
    %276 = arith.mulf %131, %275 : vector<1x4096xf32>
    %277 = arith.addf %273, %276 : vector<1x4096xf32>
    %c49 = arith.constant 49 : index
    %278 = memref.load %arg1[%c49] : memref<79xf32, #tpu.memory_space<smem>>
    %279 = vector.broadcast %278 : f32 to vector<1x4096xf32>
    %280 = arith.mulf %154, %279 : vector<1x4096xf32>
    %281 = arith.addf %277, %280 : vector<1x4096xf32>
    %c54 = arith.constant 54 : index
    %282 = memref.load %arg1[%c54] : memref<79xf32, #tpu.memory_space<smem>>
    %283 = vector.broadcast %282 : f32 to vector<1x4096xf32>
    %284 = arith.addf %281, %283 : vector<1x4096xf32>
    %cst_35 = arith.constant 0.000000e+00 : f32
    %285 = vector.broadcast %cst_35 : f32 to vector<1x4096xf32>
    %286 = arith.cmpf ogt, %284, %285 : vector<1x4096xf32>
    %cst_36 = arith.constant 0.00999999977 : f32
    %287 = vector.broadcast %cst_36 : f32 to vector<1x4096xf32>
    %288 = arith.mulf %287, %284 : vector<1x4096xf32>
    %289 = arith.select %286, %284, %288 : vector<1x4096xi1>, vector<1x4096xf32>
    %c55 = arith.constant 55 : index
    %290 = memref.load %arg1[%c55] : memref<79xf32, #tpu.memory_space<smem>>
    %291 = vector.broadcast %290 : f32 to vector<1x4096xf32>
    %292 = arith.mulf %181, %291 : vector<1x4096xf32>
    %c59 = arith.constant 59 : index
    %293 = memref.load %arg1[%c59] : memref<79xf32, #tpu.memory_space<smem>>
    %294 = vector.broadcast %293 : f32 to vector<1x4096xf32>
    %295 = arith.mulf %208, %294 : vector<1x4096xf32>
    %296 = arith.addf %292, %295 : vector<1x4096xf32>
    %c63 = arith.constant 63 : index
    %297 = memref.load %arg1[%c63] : memref<79xf32, #tpu.memory_space<smem>>
    %298 = vector.broadcast %297 : f32 to vector<1x4096xf32>
    %299 = arith.mulf %235, %298 : vector<1x4096xf32>
    %300 = arith.addf %296, %299 : vector<1x4096xf32>
    %c67 = arith.constant 67 : index
    %301 = memref.load %arg1[%c67] : memref<79xf32, #tpu.memory_space<smem>>
    %302 = vector.broadcast %301 : f32 to vector<1x4096xf32>
    %303 = arith.mulf %262, %302 : vector<1x4096xf32>
    %304 = arith.addf %300, %303 : vector<1x4096xf32>
    %c71 = arith.constant 71 : index
    %305 = memref.load %arg1[%c71] : memref<79xf32, #tpu.memory_space<smem>>
    %306 = vector.broadcast %305 : f32 to vector<1x4096xf32>
    %307 = arith.mulf %289, %306 : vector<1x4096xf32>
    %308 = arith.addf %304, %307 : vector<1x4096xf32>
    %c75 = arith.constant 75 : index
    %309 = memref.load %arg1[%c75] : memref<79xf32, #tpu.memory_space<smem>>
    %310 = vector.broadcast %309 : f32 to vector<1x4096xf32>
    %311 = arith.addf %308, %310 : vector<1x4096xf32>
    %c56 = arith.constant 56 : index
    %312 = memref.load %arg1[%c56] : memref<79xf32, #tpu.memory_space<smem>>
    %313 = vector.broadcast %312 : f32 to vector<1x4096xf32>
    %314 = arith.mulf %181, %313 : vector<1x4096xf32>
    %c60 = arith.constant 60 : index
    %315 = memref.load %arg1[%c60] : memref<79xf32, #tpu.memory_space<smem>>
    %316 = vector.broadcast %315 : f32 to vector<1x4096xf32>
    %317 = arith.mulf %208, %316 : vector<1x4096xf32>
    %318 = arith.addf %314, %317 : vector<1x4096xf32>
    %c64 = arith.constant 64 : index
    %319 = memref.load %arg1[%c64] : memref<79xf32, #tpu.memory_space<smem>>
    %320 = vector.broadcast %319 : f32 to vector<1x4096xf32>
    %321 = arith.mulf %235, %320 : vector<1x4096xf32>
    %322 = arith.addf %318, %321 : vector<1x4096xf32>
    %c68 = arith.constant 68 : index
    %323 = memref.load %arg1[%c68] : memref<79xf32, #tpu.memory_space<smem>>
    %324 = vector.broadcast %323 : f32 to vector<1x4096xf32>
    %325 = arith.mulf %262, %324 : vector<1x4096xf32>
    %326 = arith.addf %322, %325 : vector<1x4096xf32>
    %c72 = arith.constant 72 : index
    %327 = memref.load %arg1[%c72] : memref<79xf32, #tpu.memory_space<smem>>
    %328 = vector.broadcast %327 : f32 to vector<1x4096xf32>
    %329 = arith.mulf %289, %328 : vector<1x4096xf32>
    %330 = arith.addf %326, %329 : vector<1x4096xf32>
    %c76 = arith.constant 76 : index
    %331 = memref.load %arg1[%c76] : memref<79xf32, #tpu.memory_space<smem>>
    %332 = vector.broadcast %331 : f32 to vector<1x4096xf32>
    %333 = arith.addf %330, %332 : vector<1x4096xf32>
    %c57 = arith.constant 57 : index
    %334 = memref.load %arg1[%c57] : memref<79xf32, #tpu.memory_space<smem>>
    %335 = vector.broadcast %334 : f32 to vector<1x4096xf32>
    %336 = arith.mulf %181, %335 : vector<1x4096xf32>
    %c61 = arith.constant 61 : index
    %337 = memref.load %arg1[%c61] : memref<79xf32, #tpu.memory_space<smem>>
    %338 = vector.broadcast %337 : f32 to vector<1x4096xf32>
    %339 = arith.mulf %208, %338 : vector<1x4096xf32>
    %340 = arith.addf %336, %339 : vector<1x4096xf32>
    %c65 = arith.constant 65 : index
    %341 = memref.load %arg1[%c65] : memref<79xf32, #tpu.memory_space<smem>>
    %342 = vector.broadcast %341 : f32 to vector<1x4096xf32>
    %343 = arith.mulf %235, %342 : vector<1x4096xf32>
    %344 = arith.addf %340, %343 : vector<1x4096xf32>
    %c69 = arith.constant 69 : index
    %345 = memref.load %arg1[%c69] : memref<79xf32, #tpu.memory_space<smem>>
    %346 = vector.broadcast %345 : f32 to vector<1x4096xf32>
    %347 = arith.mulf %262, %346 : vector<1x4096xf32>
    %348 = arith.addf %344, %347 : vector<1x4096xf32>
    %c73 = arith.constant 73 : index
    %349 = memref.load %arg1[%c73] : memref<79xf32, #tpu.memory_space<smem>>
    %350 = vector.broadcast %349 : f32 to vector<1x4096xf32>
    %351 = arith.mulf %289, %350 : vector<1x4096xf32>
    %352 = arith.addf %348, %351 : vector<1x4096xf32>
    %c77 = arith.constant 77 : index
    %353 = memref.load %arg1[%c77] : memref<79xf32, #tpu.memory_space<smem>>
    %354 = vector.broadcast %353 : f32 to vector<1x4096xf32>
    %355 = arith.addf %352, %354 : vector<1x4096xf32>
    %c58 = arith.constant 58 : index
    %356 = memref.load %arg1[%c58] : memref<79xf32, #tpu.memory_space<smem>>
    %357 = vector.broadcast %356 : f32 to vector<1x4096xf32>
    %358 = arith.mulf %181, %357 : vector<1x4096xf32>
    %c62 = arith.constant 62 : index
    %359 = memref.load %arg1[%c62] : memref<79xf32, #tpu.memory_space<smem>>
    %360 = vector.broadcast %359 : f32 to vector<1x4096xf32>
    %361 = arith.mulf %208, %360 : vector<1x4096xf32>
    %362 = arith.addf %358, %361 : vector<1x4096xf32>
    %c66 = arith.constant 66 : index
    %363 = memref.load %arg1[%c66] : memref<79xf32, #tpu.memory_space<smem>>
    %364 = vector.broadcast %363 : f32 to vector<1x4096xf32>
    %365 = arith.mulf %235, %364 : vector<1x4096xf32>
    %366 = arith.addf %362, %365 : vector<1x4096xf32>
    %c70 = arith.constant 70 : index
    %367 = memref.load %arg1[%c70] : memref<79xf32, #tpu.memory_space<smem>>
    %368 = vector.broadcast %367 : f32 to vector<1x4096xf32>
    %369 = arith.mulf %262, %368 : vector<1x4096xf32>
    %370 = arith.addf %366, %369 : vector<1x4096xf32>
    %c74 = arith.constant 74 : index
    %371 = memref.load %arg1[%c74] : memref<79xf32, #tpu.memory_space<smem>>
    %372 = vector.broadcast %371 : f32 to vector<1x4096xf32>
    %373 = arith.mulf %289, %372 : vector<1x4096xf32>
    %374 = arith.addf %370, %373 : vector<1x4096xf32>
    %c78 = arith.constant 78 : index
    %375 = memref.load %arg1[%c78] : memref<79xf32, #tpu.memory_space<smem>>
    %376 = vector.broadcast %375 : f32 to vector<1x4096xf32>
    %377 = arith.addf %374, %376 : vector<1x4096xf32>
    %378 = math.tanh %355 : vector<1x4096xf32>
    %cst_37 = arith.constant 0.000000e+00 : f32
    %379 = vector.broadcast %cst_37 : f32 to vector<1x4096xf32>
    %380 = arith.maximumf %377, %379 : vector<1x4096xf32>
    %381 = vector.broadcast %cst_37 : f32 to vector<1x4096xf32>
    %382 = arith.subf %377, %381 : vector<1x4096xf32>
    %383 = arith.cmpf one, %382, %382 : vector<1x4096xf32>
    %384 = vector.broadcast %cst_37 : f32 to vector<1x4096xf32>
    %385 = arith.addf %377, %384 : vector<1x4096xf32>
    %386 = math.absf %382 : vector<1x4096xf32>
    %cst_38 = arith.constant 0.000000e+00 : f32
    %387 = vector.broadcast %cst_38 : f32 to vector<1x4096xf32>
    %388 = arith.subf %387, %386 : vector<1x4096xf32>
    %389 = math.exp %388 : vector<1x4096xf32>
    %390 = math.log1p %389 : vector<1x4096xf32>
    %391 = arith.addf %380, %390 : vector<1x4096xf32>
    %392 = arith.select %383, %385, %391 : vector<1x4096xi1>, vector<1x4096xf32>
    %cst_39 = arith.constant 9.99999974E-6 : f32
    %393 = vector.broadcast %cst_39 : f32 to vector<1x4096xf32>
    %394 = arith.addf %392, %393 : vector<1x4096xf32>
    %cst_40 = arith.constant 9.99999974E-6 : f32
    %cst_41 = arith.constant 2.000000e+00 : f32
    %395 = vector.broadcast %cst_40 : f32 to vector<1x4096xf32>
    %396 = arith.maximumf %395, %394 : vector<1x4096xf32>
    %397 = vector.broadcast %cst_41 : f32 to vector<1x4096xf32>
    %398 = arith.minimumf %397, %396 : vector<1x4096xf32>
    %399 = tpu.concatenate %311, %333, %378, %398 in 0 : vector<1x4096xf32>, vector<1x4096xf32>, vector<1x4096xf32>, vector<1x4096xf32> -> vector<4x4096xf32>
    %c0_42 = arith.constant 0 : index
    %c0_43 = arith.constant 0 : index
    %400 = vector.load %arg4[%c0_42, %c0_43] : memref<4x4096xf32, #tpu.memory_space<vmem>>, vector<4x4096xf32>
    tpu.vector_store %arg4[%c0_42, %c0_43], %399 {strides = array<i32>} : memref<4x4096xf32, #tpu.memory_space<vmem>>, vector<4x4096xf32>,
    return
  }
  func.func @transform_0(%arg0: i32, %arg1: memref<79xf32, #tpu.memory_space<smem>>) -> (i32, i32) {
    %c0_i32 = arith.constant 0 : i32
    %c0_i32_0 = arith.constant 0 : i32
    return %c0_i32, %arg0 : i32, i32
  }
  func.func @transform_1(%arg0: i32, %arg1: memref<79xf32, #tpu.memory_space<smem>>) -> (i32, i32) {
    %c0_i32 = arith.constant 0 : i32
    %c0_i32_0 = arith.constant 0 : i32
    return %c0_i32, %arg0 : i32, i32
  }
  func.func @transform_2(%arg0: i32, %arg1: memref<79xf32, #tpu.memory_space<smem>>) -> (i32, i32) {
    %c0_i32 = arith.constant 0 : i32
    %c0_i32_0 = arith.constant 0 : i32
    return %c0_i32, %arg0 : i32, i32
  }
}

</mosaic_0001>

<bundles_post_ra>
// kernel: policy_forward.1
= control target key start
LH: loop header
LB: loop body
LE: loop exit
PB: predicated region body
PF: predicated region fallthrough
CT: control target
= control target key end

     0   :  { %s3764_s0 = inlined_call_operand.vmem [shape: f32[79], index: 0, kind: input, shape index: {}]   ;;  %s3765_s1 = inlined_call_operand.vmem [shape: f32[2,4096], index: 1, kind: input, shape index: {}]   ;;  %s3766_s2 = inlined_call_operand.vmem [shape: f32[2,4096], index: 2, kind: input, shape index: {}]   ;;  %s3767_s3 = inlined_call_operand.vmem [shape: f32[4,4096], index: 3, kind: output, shape index: {}]  }
   0x1   :  { %s8_s14 = sshll.u32 %s3764_s0, 4  ;;  %s9_s14 = int_to_ptr.vmem [resolvable:$true] %s8_s14 }
   0x2   :  { %s2026_s15 = scalar_lea.vmem %s9_s14, 16  ;;  %p2031_p1 = scmp.lt.s32.totalorder %s9_s14, %s9_s14 }
   0x3   :  { %p2027_p0 = scmp.ne.s32.totalorder %s9_s14, %s2026_s15  ;;  %p2032_p2 = scmp.lt.s32.totalorder %s2026_s15, %s2026_s15 }
   0x5   :  { %p2033_p3 = por %p2032_p2, %p2031_p1 }
   0x7   :  { %p2034_p4 = pnand %p2033_p3, %p2027_p0 }
   0x9   :  { %2037 = shalt.err (!%p2034_p4)  }
   0xa   :  { %s2040_s16 = smov [#allocation3]  }
   0xb   :  { %11 = dma.vmem_to_smem %s9_s14, 16, %s2040_s16, [#allocation2] }
   0xc   :  { %2038 = dma.done.wait [#allocation2], 16 }
   0xd   :  { %2039 = vsyncadd [#allocation2], 4294967280 }
   0xe   :  { %13 = sfence }
   0xf   :  { %v18_v0 = vld [vmem:[%s3765_s1] ss:$2 sm:$0xff]  ;;  %v1877_v1 = vld [vmem:[%s3765_s1 + $0x10] ss:$2 sm:$0xff]  ;;  %v1880_v4 = vld [vmem:[%s3765_s1 + $0x1] ss:$2 sm:$0xff] }
  0x10   :  { %v1878_v2 = vld [vmem:[%s3765_s1 + $0x20] ss:$2 sm:$0xff]  ;;  %v1879_v3 = vld [vmem:[%s3765_s1 + $0x30] ss:$2 sm:$0xff]  ;;  %v1881_v5 = vld [vmem:[%s3765_s1 + $0x11] ss:$2 sm:$0xff]  ;;  %v48_v8 = vmin.f32 %v18_v0, %v1880_v4  ;;  %v52_v10 = vmax.f32 %v18_v0, %v1880_v4 }
  0x11   :  { %v1882_v6 = vld [vmem:[%s3765_s1 + $0x21] ss:$2 sm:$0xff]  ;;  %v1883_v7 = vld [vmem:[%s3765_s1 + $0x31] ss:$2 sm:$0xff]  ;;  %v49_v9 = vmin.f32 %v1877_v1, %v1881_v5  ;;  %v53_v11 = vmax.f32 %v1877_v1, %v1881_v5  ;;  %v33_v16 = vld [vmem:[%s3766_s2] ss:$2 sm:$0xff] }
  0x12   :  { %v50_v12 = vmin.f32 %v1878_v2, %v1882_v6  ;;  %v51_v13 = vmin.f32 %v1879_v3, %v1883_v7  ;;  %v54_v14 = vmax.f32 %v1878_v2, %v1882_v6  ;;  %v55_v15 = vmax.f32 %v1879_v3, %v1883_v7  ;;  %v1884_v21 = vld [vmem:[%s3766_s2 + $0x10] ss:$2 sm:$0xff]  ;;  %v1887_v22 = vld [vmem:[%s3766_s2 + $0x1] ss:$2 sm:$0xff]  ;;  %v2100_v23 = vld [vmem:[%s3766_s2 + $0x11] ss:$2 sm:$0xff] }
  0x13   :  { %v56_v17 = vsub.f32 %v52_v10, %v48_v8  ;;  %v57_v18 = vsub.f32 %v53_v11, %v49_v9  ;;  %v68_v19 = vsub.f32 %v18_v0, %v48_v8  ;;  %v69_v20 = vsub.f32 %v1877_v1, %v49_v9  ;;  %v1885_v28 = vld [vmem:[%s3766_s2 + $0x20] ss:$2 sm:$0xff]  ;;  %v1886_v37 = vld [vmem:[%s3766_s2 + $0x30] ss:$2 sm:$0xff]  ;;  %v1889_v38 = vld [vmem:[%s3766_s2 + $0x21] ss:$2 sm:$0xff] }
  0x14   :  { %v58_v24 = vsub.f32 %v54_v14, %v50_v12  ;;  %v59_v25 = vsub.f32 %v55_v15, %v51_v13  ;;  %v70_v26 = vsub.f32 %v1878_v2, %v50_v12  ;;  %v71_v27 = vsub.f32 %v1879_v3, %v51_v13  ;;  %v2120_v39 = vld [vmem:[%s3766_s2 + $0x31] ss:$2 sm:$0xff]  ;;  %s2123_s20 = sld [smem:[#allocation3]]  ;;  %s2125_s0 = sld [smem:[#allocation3 + $0x5]] }
  0x15   :  { %v60_v29 = vadd.f32 1e-08, %v56_v17  ;;  %v61_v30 = vadd.f32 1e-08, %v57_v18  ;;  %v72_v31 = vmul.f32 2.0, %v68_v19  ;;  %v2105_v32 = vmul.f32 2.0, %v69_v20 }
  0x16   :  { %v62_v33 = vadd.f32 1e-08, %v58_v24  ;;  %v63_v34 = vadd.f32 1e-08, %v59_v25  ;;  %v2107_v35 = vmul.f32 2.0, %v70_v26  ;;  %v2109_v36 = vmul.f32 2.0, %v71_v27 }
  0x17   :  { %1986 = vrcp.f32 %v60_v29  ;;  %v84_v40 = vsub.f32 %v1880_v4, %v48_v8  ;;  %v85_v41 = vsub.f32 %v1881_v5, %v49_v9  ;;  %v86_v42 = vsub.f32 %v1882_v6, %v50_v12  ;;  %s2142_s2 = sld [smem:[#allocation3 + $0xa]]  ;;  %s2144_s21 = sld [smem:[#allocation3 + $0xf]] }
  0x18   :  { %1988 = vrcp.f32 %v61_v30  ;;  %v87_v43 = vsub.f32 %v1883_v7, %v51_v13  ;;  %v100_v44 = vmin.f32 %v33_v16, %v1887_v22  ;;  %v101_v45 = vmin.f32 %v1884_v21, %v2100_v23  ;;  %s2146_s22 = sld [smem:[#allocation3 + $0x14]]  ;;  %s2148_s23 = sld [smem:[#allocation3 + $0x1]] }
  0x19   :  { %1990 = vrcp.f32 %v62_v33  ;;  %v88_v46 = vmul.f32 2.0, %v84_v40  ;;  %v89_v47 = vmul.f32 2.0, %v85_v41  ;;  %v90_v48 = vmul.f32 2.0, %v86_v42  ;;  %s2151_s24 = sld [smem:[#allocation3 + $0x6]]  ;;  %s2153_s25 = sld [smem:[#allocation3 + $0xb]] }
  0x1a   :  { %1992 = vrcp.f32 %v63_v34  ;;  %v91_v49 = vmul.f32 2.0, %v87_v43  ;;  %v102_v50 = vmin.f32 %v1885_v28, %v1889_v38  ;;  %v103_v51 = vmin.f32 %v1886_v37, %v2120_v39  ;;  %s2223_s26 = sld [smem:[#allocation3 + $0x10]]  ;;  %s2225_s27 = sld [smem:[#allocation3 + $0x2]] }
  0x1b   :  { %v104_v52 = vmax.f32 %v33_v16, %v1887_v22  ;;  %v105_v53 = vmax.f32 %v1884_v21, %v2100_v23  ;;  %v106_v54 = vmax.f32 %v1885_v28, %v1889_v38  ;;  %v107_v55 = vmax.f32 %v1886_v37, %v2120_v39  ;;  %s2229_s28 = sld [smem:[#allocation3 + $0x15]]  ;;  %s2238_s29 = sld [smem:[#allocation3 + $0x7]] }
  0x1c   :  { %v120_v56 = vsub.f32 %v33_v16, %v100_v44  ;;  %v121_v57 = vsub.f32 %v1884_v21, %v101_v45  ;;  %v122_v58 = vsub.f32 %v1885_v28, %v102_v50  ;;  %v123_v59 = vsub.f32 %v1886_v37, %v103_v51  ;;  %s2255_s30 = sld [smem:[#allocation3 + $0xc]]  ;;  %s2259_s4 = sld [smem:[#allocation3 + $0x11]] }
  0x1d   :  { %v108_v60 = vsub.f32 %v104_v52, %v100_v44  ;;  %v109_v61 = vsub.f32 %v105_v53, %v101_v45  ;;  %v110_v62 = vsub.f32 %v106_v54, %v102_v50  ;;  %v111_v63 = vsub.f32 %v107_v55, %v103_v51  ;;  %s2261_s5 = sld [smem:[#allocation3 + $0x3]]  ;;  %s2269_s6 = sld [smem:[#allocation3 + $0x16]] }
  0x1e   :  { %v2130_v0 = vmul.f32 2.0, %v120_v56  ;;  %v2132_v1 = vmul.f32 2.0, %v121_v57  ;;  %v2134_v2 = vmul.f32 2.0, %v122_v58  ;;  %v2136_v3 = vmul.f32 2.0, %v123_v59  ;;  %s2271_s7 = sld [smem:[#allocation3 + $0x8]]  ;;  %s2280_s8 = sld [smem:[#allocation3 + $0xd]] }
  0x1f   :  { %v112_v4 = vadd.f32 1e-08, %v108_v60  ;;  %v113_v5 = vadd.f32 1e-08, %v109_v61  ;;  %v114_v6 = vadd.f32 1e-08, %v110_v62  ;;  %v136_v7 = vsub.f32 %v1887_v22, %v100_v44 }
  0x20   :  { %v115_v8 = vadd.f32 1e-08, %v111_v63  ;;  %v137_v9 = vsub.f32 %v2100_v23, %v101_v45  ;;  %v138_v10 = vsub.f32 %v1889_v38, %v102_v50  ;;  %v139_v11 = vsub.f32 %v2120_v39, %v103_v51  ;;  %s2282_s1 = sld [smem:[#allocation3 + $0x12]]  ;;  %s2295_s9 = sld [smem:[#allocation3 + $0x17]] }
  0x21   :  { %v1987_v12 = vpop.eup %1986  ;;  %1994 = vrcp.f32 %v112_v4  ;;  %v140_v13 = vmul.f32 2.0, %v136_v7  ;;  %v153_v14 = vstv %s2123_s20  ;;  %v159_v15 = vstv %s2125_s0  ;;  %s2313_s10 = sld [smem:[#allocation3 + $0x4]]  ;;  %s2315_s11 = sld [smem:[#allocation3 + $0x9]] }
  0x22   :  { %v1989_v16 = vpop.eup %1988  ;;  %v76_v17 = vmul.f32 %v1987_v12, %v72_v31  ;;  %v92_v18 = vmul.f32 %v1987_v12, %v88_v46  ;;  %1996 = vrcp.f32 %v113_v5  ;;  %v141_v19 = vmul.f32 2.0, %v137_v9  ;;  %s2328_s12 = sld [smem:[#allocation3 + $0xe]]  ;;  %s2340_s13 = sld [smem:[#allocation3 + $0x13]] }
  0x23   :  { %v1991_v20 = vpop.eup %1990  ;;  %v77_v21 = vmul.f32 %v1989_v16, %v2105_v32  ;;  %v93_v22 = vmul.f32 %v1989_v16, %v89_v47  ;;  %1998 = vrcp.f32 %v114_v6  ;;  %v142_v23 = vmul.f32 2.0, %v138_v10  ;;  %s2346_s14 = sld [smem:[#allocation3 + $0x18]]  ;;  %s2348_s15 = sld [smem:[#allocation3 + $0x19]] }
  0x24   :  { %v1993_v24 = vpop.eup %1992  ;;  %v78_v25 = vmul.f32 %v1991_v20, %v2107_v35  ;;  %v2156_v26 = vadd.f32 -1.0, %v76_v17  ;;  %v94_v27 = vmul.f32 %v1991_v20, %v90_v48  ;;  %v2158_v28 = vadd.f32 -1.0, %v92_v18  ;;  %s2352_s16 = sld [smem:[#allocation3 + $0x1e]]  ;;  %s2374_s17 = sld [smem:[#allocation3 + $0x23]] }
  0x25   :  { %v79_v29 = vmul.f32 %v1993_v24, %v2109_v36  ;;  %v2161_v30 = vadd.f32 -1.0, %v77_v21  ;;  %v95_v31 = vmul.f32 %v1993_v24, %v91_v49  ;;  %v2163_v32 = vadd.f32 -1.0, %v93_v22  ;;  %s2377_s18 = sld [smem:[#allocation3 + $0x28]]  ;;  %s2382_s19 = sld [smem:[#allocation3 + $0x2d]] }
  0x26   :  { %v2165_v33 = vadd.f32 -1.0, %v78_v25  ;;  %v2167_v34 = vadd.f32 -1.0, %v94_v27  ;;  %2000 = vrcp.f32 %v115_v8  ;;  %v143_v35 = vmul.f32 2.0, %v139_v11  ;;  %s2384_s20 = sld [smem:[#allocation3 + $0x1a]] }
  0x27   :  { %v2169_v37 = vadd.f32 -1.0, %v79_v29  ;;  %v2171_v38 = vadd.f32 -1.0, %v95_v31  ;;  %v154_v36 = vmul.f32 %v2156_v26, %v153_v14  ;;  %v155_v39 = vmul.f32 %v2161_v30, %v153_v14  ;;  %s2395_s0 = sld [smem:[#allocation3 + $0x32]] }
  0x28   :  { %v156_v40 = vmul.f32 %v2165_v33, %v153_v14  ;;  %v160_v41 = vmul.f32 %v2158_v28, %v159_v15  ;;  %v161_v42 = vmul.f32 %v2163_v32, %v159_v15  ;;  %v162_v43 = vmul.f32 %v2167_v34, %v159_v15 }
  0x29   :  { %v157_v44 = vmul.f32 %v2169_v37, %v153_v14  ;;  %v163_v45 = vmul.f32 %v2171_v38, %v159_v15  ;;  %v169_v46 = vstv %s2142_s2  ;;  %v179_v47 = vstv %s2144_s21  ;;  %s1938_s2 = sld [smem:[#allocation3 + $0x1f]]  ;;  %s1939_s21 = sld [smem:[#allocation3 + $0x24]] }
  0x2a   :  { %v164_v48 = vadd.f32 %v160_v41, %v154_v36  ;;  %v165_v49 = vadd.f32 %v161_v42, %v155_v39  ;;  %v166_v50 = vadd.f32 %v162_v43, %v156_v40  ;;  %v2184_v51 = vstv %s2146_s22  ;;  %s1940_s22 = sld [smem:[#allocation3 + $0x29]] }
  0x2b   :  { %v1995_v52 = vpop.eup %1994  ;;  %v167_v53 = vadd.f32 %v163_v45, %v157_v44  ;;  %v207_v54 = vstv %s2148_s23  ;;  %v213_v55 = vstv %s2151_s24  ;;  %v223_v56 = vstv %s2153_s25  ;;  %s1941_s23 = sld [smem:[#allocation3 + $0x2e]]  ;;  %s2435_s24 = sld [smem:[#allocation3 + $0x1b]] }
  0x2c   :  { %v1997_v57 = vpop.eup %1996  ;;  %v128_v58 = vmul.f32 %v1995_v52, %v2130_v0  ;;  %v144_v59 = vmul.f32 %v1995_v52, %v140_v13  ;;  %v208_v60 = vmul.f32 %v2156_v26, %v207_v54  ;;  %v209_v61 = vmul.f32 %v2161_v30, %v207_v54  ;;  %s2437_s25 = sld [smem:[#allocation3 + $0x20]] }
  0x2d   :  { %v1999_v62 = vpop.eup %1998  ;;  %v129_v63 = vmul.f32 %v1997_v57, %v2132_v1  ;;  %v145_v4 = vmul.f32 %v1997_v57, %v141_v19  ;;  %v210_v5 = vmul.f32 %v2165_v33, %v207_v54  ;;  %v211_v6 = vmul.f32 %v2169_v37, %v207_v54 }
  0x2e   :  { %v130_v7 = vmul.f32 %v1999_v62, %v2134_v2  ;;  %v2196_v8 = vadd.f32 -1.0, %v128_v58  ;;  %v146_v9 = vmul.f32 %v1999_v62, %v142_v23  ;;  %v2198_v10 = vadd.f32 -1.0, %v144_v59 }
  0x2f   :  { %v2200_v0 = vadd.f32 -1.0, %v129_v63  ;;  %v2202_v11 = vadd.f32 -1.0, %v145_v4  ;;  %v214_v12 = vmul.f32 %v2158_v28, %v213_v55  ;;  %v215_v1 = vmul.f32 %v2163_v32, %v213_v55 }
  0x30   :  { %v2001_v13 = vpop.eup %2000  ;;  %v2206_v14 = vadd.f32 -1.0, %v130_v7  ;;  %v2208_v15 = vadd.f32 -1.0, %v146_v9  ;;  %v170_v2 = vmul.f32 %v2196_v8, %v169_v46  ;;  %v180_v16 = vmul.f32 %v2198_v10, %v179_v47 }
  0x31   :  { %v131_v17 = vmul.f32 %v2001_v13, %v2136_v3  ;;  %v147_v18 = vmul.f32 %v2001_v13, %v143_v35  ;;  %v171_v19 = vmul.f32 %v2200_v0, %v169_v46  ;;  %v181_v20 = vmul.f32 %v2202_v11, %v179_v47 }
  0x32   :  { %v172_v21 = vmul.f32 %v2206_v14, %v169_v46  ;;  %v174_v22 = vadd.f32 %v170_v2, %v164_v48  ;;  %v182_v23 = vmul.f32 %v2208_v15, %v179_v47  ;;  %v216_v24 = vmul.f32 %v2167_v34, %v213_v55 }
  0x33   :  { %v2218_v25 = vadd.f32 -1.0, %v131_v17  ;;  %v2220_v27 = vadd.f32 -1.0, %v147_v18  ;;  %v175_v29 = vadd.f32 %v171_v19, %v165_v49  ;;  %v217_v31 = vmul.f32 %v2171_v38, %v213_v55 }
  0x34   :  { %v176_v3 = vadd.f32 %v172_v21, %v166_v50  ;;  %v184_v35 = vadd.f32 %v180_v16, %v174_v22  ;;  %v218_v36 = vadd.f32 %v214_v12, %v208_v60  ;;  %v219_v39 = vadd.f32 %v215_v1, %v209_v61 }
  0x35   :  { %v173_v40 = vmul.f32 %v2218_v25, %v169_v46  ;;  %v183_v41 = vmul.f32 %v2220_v27, %v179_v47  ;;  %v185_v42 = vadd.f32 %v181_v20, %v175_v29  ;;  %v220_v43 = vadd.f32 %v216_v24, %v210_v5 }
  0x36   :  { %v186_v44 = vadd.f32 %v182_v23, %v176_v3  ;;  %v190_v45 = vadd.f32 %v2184_v51, %v184_v35  ;;  %v221_v48 = vadd.f32 %v217_v31, %v211_v6  ;;  %v224_v49 = vmul.f32 %v2196_v8, %v223_v56 }
  0x37   :  { %v177_v50 = vadd.f32 %v173_v40, %v167_v53  ;;  %v191_v52 = vadd.f32 %v2184_v51, %v185_v42  ;;  %v225_v54 = vmul.f32 %v2200_v0, %v223_v56  ;;  %v226_v55 = vmul.f32 %v2206_v14, %v223_v56 }
  0x38   :  { %v192_v46 = vadd.f32 %v2184_v51, %v186_v44  ;;  %vm194_vm0 = vcmp.gt.f32.partialorder %v190_v45, 0.0  ;;  %v198_v47 = vmul.f32 0.01, %v190_v45  ;;  %v227_v57 = vmul.f32 %v2218_v25, %v223_v56 }
  0x39   :  { %v187_v58 = vadd.f32 %v183_v41, %v177_v50  ;;  %vm195_vm1 = vcmp.gt.f32.partialorder %v191_v52, 0.0  ;;  %v199_v59 = vmul.f32 0.01, %v191_v52  ;;  %v228_v61 = vadd.f32 %v224_v49, %v218_v36 }
  0x3a   :  { %vm196_vm2 = vcmp.gt.f32.partialorder %v192_v46, 0.0  ;;  %v200_v53 = vmul.f32 0.01, %v192_v46  ;;  %v2240_v60 = vsel %vm194_vm0, %v190_v45, %v198_v47  ;;  %v229_v4 = vadd.f32 %v225_v54, %v219_v39 }
  0x3b   :  { %v193_v62 = vadd.f32 %v2184_v51, %v187_v58  ;;  %v2243_v63 = vsel %vm195_vm1, %v191_v52, %v199_v59  ;;  %v230_v5 = vadd.f32 %v226_v55, %v220_v43  ;;  %v231_v56 = vadd.f32 %v227_v57, %v221_v48 }
  0x3c   :  { %v2245_v6 = vsel %vm196_vm2, %v192_v46, %v200_v53  ;;  %v233_v7 = vstv %s2223_s26  ;;  %v261_v9 = vstv %s2225_s27  ;;  %v243_v13 = vstv %s2229_s28  ;;  %s2439_s26 = sld [smem:[#allocation3 + $0x33]]  ;;  %s2458_s27 = sld [smem:[#allocation3 + $0x25]] }
  0x3d   :  { %vm197_vm3 = vcmp.gt.f32.partialorder %v193_v62, 0.0  ;;  %v234_v12 = vmul.f32 %v2198_v10, %v233_v7  ;;  %v235_v1 = vmul.f32 %v2202_v11, %v233_v7  ;;  %v201_v2 = vmul.f32 0.01, %v193_v62  ;;  %s2460_s28 = sld [smem:[#allocation3 + $0x2a]] }
  0x3e   :  { %v236_v16 = vmul.f32 %v2208_v15, %v233_v7  ;;  %v237_v51 = vmul.f32 %v2220_v27, %v233_v7  ;;  %v262_v17 = vmul.f32 %v2156_v26, %v261_v9  ;;  %v263_v20 = vmul.f32 %v2161_v30, %v261_v9 }
  0x3f   :  { %v238_v18 = vadd.f32 %v234_v12, %v228_v61  ;;  %v239_v19 = vadd.f32 %v235_v1, %v229_v4  ;;  %v264_v21 = vmul.f32 %v2165_v33, %v261_v9  ;;  %v265_v24 = vmul.f32 %v2169_v37, %v261_v9 }
  0x40   :  { %v240_v22 = vadd.f32 %v236_v16, %v230_v5  ;;  %v241_v23 = vadd.f32 %v237_v51, %v231_v56  ;;  %v267_v29 = vstv %s2238_s29  ;;  %v2274_v49 = vsel %vm197_vm3, %v193_v62, %v201_v2  ;;  %s2465_s29 = sld [smem:[#allocation3 + $0x2f]] }
  0x41   :  { %v244_v31 = vadd.f32 %v243_v13, %v238_v18  ;;  %v245_v3 = vadd.f32 %v243_v13, %v239_v19  ;;  %v268_v35 = vmul.f32 %v2158_v28, %v267_v29  ;;  %v269_v36 = vmul.f32 %v2163_v32, %v267_v29 }
  0x42   :  { %v246_v39 = vadd.f32 %v243_v13, %v240_v22  ;;  %v247_v40 = vadd.f32 %v243_v13, %v241_v23  ;;  %v270_v41 = vmul.f32 %v2167_v34, %v267_v29  ;;  %v271_v42 = vmul.f32 %v2171_v38, %v267_v29 }
  0x43   :  { %vm248_vm4 = vcmp.gt.f32.partialorder %v244_v31, 0.0  ;;  %vm249_vm5 = vcmp.gt.f32.partialorder %v245_v3, 0.0  ;;  %v252_v43 = vmul.f32 0.01, %v244_v31  ;;  %v253_v44 = vmul.f32 0.01, %v245_v3 }
  0x44   :  { %vm250_vm6 = vcmp.gt.f32.partialorder %v246_v39, 0.0  ;;  %vm251_vm7 = vcmp.gt.f32.partialorder %v247_v40, 0.0  ;;  %v254_v45 = vmul.f32 0.01, %v246_v39  ;;  %v255_v48 = vmul.f32 0.01, %v247_v40 }
  0x45   :  { %v2276_v50 = vsel %vm248_vm4, %v244_v31, %v252_v43  ;;  %v2278_v52 = vsel %vm249_vm5, %v245_v3, %v253_v44  ;;  %v272_v54 = vadd.f32 %v268_v35, %v262_v17  ;;  %v273_v46 = vadd.f32 %v269_v36, %v263_v20 }
  0x46   :  { %v2284_v55 = vsel %vm250_vm6, %v246_v39, %v254_v45  ;;  %v274_v47 = vadd.f32 %v270_v41, %v264_v21  ;;  %v275_v57 = vadd.f32 %v271_v42, %v265_v24  ;;  %v2286_v58 = vsel %vm251_vm7, %v247_v40, %v255_v48 }
  0x47   :  { %v277_v59 = vstv %s2255_s30  ;;  %v287_v53 = vstv %s2259_s4  ;;  %v315_v61 = vstv %s2261_s5  ;;  %v297_v17 = vstv %s2269_s6  ;;  %s2468_s30 = sld [smem:[#allocation3 + $0x1c]]  ;;  %s2512_s5 = sld [smem:[#allocation3 + $0x21]] }
  0x48   :  { %v278_v62 = vmul.f32 %v2196_v8, %v277_v59  ;;  %v279_v4 = vmul.f32 %v2200_v0, %v277_v59  ;;  %v280_v5 = vmul.f32 %v2206_v14, %v277_v59  ;;  %v281_v56 = vmul.f32 %v2218_v25, %v277_v59  ;;  %s2502_s4 = sld [smem:[#allocation3 + $0x34]]  ;;  %s2522_s6 = sld [smem:[#allocation3 + $0x26]] }
  0x49   :  { %v288_v7 = vmul.f32 %v2198_v10, %v287_v53  ;;  %v289_v9 = vmul.f32 %v2202_v11, %v287_v53  ;;  %v290_v12 = vmul.f32 %v2208_v15, %v287_v53  ;;  %v291_v1 = vmul.f32 %v2220_v27, %v287_v53 }
  0x4a   :  { %v282_v13 = vadd.f32 %v278_v62, %v272_v54  ;;  %v283_v2 = vadd.f32 %v279_v4, %v273_v46  ;;  %v284_v16 = vadd.f32 %v280_v5, %v274_v47  ;;  %v285_v51 = vadd.f32 %v281_v56, %v275_v57 }
  0x4b   :  { %v316_v18 = vmul.f32 %v2156_v26, %v315_v61  ;;  %v317_v19 = vmul.f32 %v2161_v30, %v315_v61  ;;  %v318_v20 = vmul.f32 %v2165_v33, %v315_v61  ;;  %v319_v29 = vmul.f32 %v2169_v37, %v315_v61 }
  0x4c   :  { %v292_v21 = vadd.f32 %v288_v7, %v282_v13  ;;  %v293_v22 = vadd.f32 %v289_v9, %v283_v2  ;;  %v294_v23 = vadd.f32 %v290_v12, %v284_v16  ;;  %v295_v24 = vadd.f32 %v291_v1, %v285_v51 }
  0x4d   :  { %v321_v31 = vstv %s2271_s7  ;;  %v331_v3 = vstv %s2280_s8  ;;  %v341_v35 = vstv %s2282_s1  ;;  %v351_v48 = vstv %s2295_s9  ;;  %s2528_s7 = sld [smem:[#allocation3 + $0x2b]]  ;;  %s2530_s8 = sld [smem:[#allocation3 + $0x30]] }
  0x4e   :  { %v298_v36 = vadd.f32 %v297_v17, %v292_v21  ;;  %v299_v39 = vadd.f32 %v297_v17, %v293_v22  ;;  %v300_v40 = vadd.f32 %v297_v17, %v294_v23  ;;  %v301_v41 = vadd.f32 %v297_v17, %v295_v24  ;;  %s2561_s1 = sld [smem:[#allocation3 + $0x35]] }
  0x4f   :  { %v322_v42 = vmul.f32 %v2158_v28, %v321_v31  ;;  %v323_v43 = vmul.f32 %v2163_v32, %v321_v31  ;;  %v324_v44 = vmul.f32 %v2167_v34, %v321_v31  ;;  %v325_v45 = vmul.f32 %v2171_v38, %v321_v31  ;;  %s2572_s9 = sld [smem:[#allocation3 + $0x1d]] }
  0x50   :  { %vm302_vm8 = vcmp.gt.f32.partialorder %v298_v36, 0.0  ;;  %vm303_vm9 = vcmp.gt.f32.partialorder %v299_v39, 0.0  ;;  %vm304_vm10 = vcmp.gt.f32.partialorder %v300_v40, 0.0  ;;  %v306_v54 = vmul.f32 0.01, %v298_v36 }
  0x51   :  { %v307_v46 = vmul.f32 0.01, %v299_v39  ;;  %v308_v47 = vmul.f32 0.01, %v300_v40  ;;  %v326_v57 = vadd.f32 %v322_v42, %v316_v18  ;;  %vm305_vm11 = vcmp.gt.f32.partialorder %v301_v41, 0.0 }
  0x52   :  { %v327_v59 = vadd.f32 %v323_v43, %v317_v19  ;;  %v328_v53 = vadd.f32 %v324_v44, %v318_v20  ;;  %v329_v61 = vadd.f32 %v325_v45, %v319_v29  ;;  %v309_v62 = vmul.f32 0.01, %v301_v41 }
  0x53   :  { %v2318_v4 = vsel %vm302_vm8, %v298_v36, %v306_v54  ;;  %v2320_v5 = vsel %vm303_vm9, %v299_v39, %v307_v46  ;;  %v332_v56 = vmul.f32 %v2196_v8, %v331_v3  ;;  %v2323_v7 = vsel %vm304_vm10, %v300_v40, %v308_v47 }
  0x54   :  { %v333_v9 = vmul.f32 %v2200_v0, %v331_v3  ;;  %v334_v12 = vmul.f32 %v2206_v14, %v331_v3  ;;  %v335_v1 = vmul.f32 %v2218_v25, %v331_v3  ;;  %v342_v2 = vmul.f32 %v2198_v10, %v341_v35 }
  0x55   :  { %v336_v13 = vadd.f32 %v332_v56, %v326_v57  ;;  %v343_v16 = vmul.f32 %v2202_v11, %v341_v35  ;;  %v344_v51 = vmul.f32 %v2208_v15, %v341_v35  ;;  %v345_v20 = vmul.f32 %v2220_v27, %v341_v35 }
  0x56   :  { %v337_v17 = vadd.f32 %v333_v9, %v327_v59  ;;  %v338_v18 = vadd.f32 %v334_v12, %v328_v53  ;;  %v339_v19 = vadd.f32 %v335_v1, %v329_v61  ;;  %v2335_v21 = vsel %vm305_vm11, %v301_v41, %v309_v62 }
  0x57   :  { %v346_v22 = vadd.f32 %v342_v2, %v336_v13  ;;  %v369_v23 = vstv %s2313_s10  ;;  %v375_v24 = vstv %s2315_s11  ;;  %v395_v12 = vstv %s2340_s13  ;;  %s2574_s10 = sld [smem:[#allocation3 + $0x22]]  ;;  %s2596_s11 = sld [smem:[#allocation3 + $0x27]] }
  0x58   :  { %v347_v29 = vadd.f32 %v343_v16, %v337_v17  ;;  %v348_v31 = vadd.f32 %v344_v51, %v338_v18  ;;  %v349_v3 = vadd.f32 %v345_v20, %v339_v19  ;;  %v370_v36 = vmul.f32 %v2156_v26, %v369_v23  ;;  %s2601_s13 = sld [smem:[#allocation3 + $0x31]] }
  0x59   :  { %v352_v39 = vadd.f32 %v351_v48, %v346_v22  ;;  %v371_v40 = vmul.f32 %v2161_v30, %v369_v23  ;;  %v372_v42 = vmul.f32 %v2165_v33, %v369_v23  ;;  %v373_v35 = vmul.f32 %v2169_v37, %v369_v23 }
  0x5a   :  { %v353_v41 = vadd.f32 %v351_v48, %v347_v29  ;;  %v354_v43 = vadd.f32 %v351_v48, %v348_v31  ;;  %v355_v44 = vadd.f32 %v351_v48, %v349_v3  ;;  %v376_v45 = vmul.f32 %v2158_v28, %v375_v24 }
  0x5b   :  { %vm356_vm12 = vcmp.gt.f32.partialorder %v352_v39, 0.0  ;;  %v360_v26 = vmul.f32 0.01, %v352_v39  ;;  %v377_v54 = vmul.f32 %v2163_v32, %v375_v24  ;;  %v378_v30 = vmul.f32 %v2167_v34, %v375_v24 }
  0x5c   :  { %vm357_vm13 = vcmp.gt.f32.partialorder %v353_v41, 0.0  ;;  %vm358_vm14 = vcmp.gt.f32.partialorder %v354_v43, 0.0  ;;  %v361_v33 = vmul.f32 0.01, %v353_v41  ;;  %v385_v37 = vstv %s2328_s12  ;;  %s2598_s12 = sld [smem:[#allocation3 + $0x2c]] }
  0x5d   :  { %vm359_vm15 = vcmp.gt.f32.partialorder %v355_v44, 0.0  ;;  %v362_v48 = vmul.f32 0.01, %v354_v43  ;;  %v363_v28 = vmul.f32 0.01, %v355_v44  ;;  %v379_v46 = vmul.f32 %v2171_v38, %v375_v24 }
  0x5e   :  { %v2356_v47 = vsel %vm356_vm12, %v352_v39, %v360_v26  ;;  %v380_v57 = vadd.f32 %v376_v45, %v370_v36  ;;  %v381_v59 = vadd.f32 %v377_v54, %v371_v40  ;;  %v382_v53 = vadd.f32 %v378_v30, %v372_v42 }
  0x5f   :  { %v2358_v32 = vsel %vm357_vm13, %v353_v41, %v361_v33  ;;  %v2360_v34 = vsel %vm358_vm14, %v354_v43, %v362_v48  ;;  %v383_v61 = vadd.f32 %v379_v46, %v373_v35  ;;  %v386_v62 = vmul.f32 %v2196_v8, %v385_v37 }
  0x60   :  { %v387_v56 = vmul.f32 %v2200_v0, %v385_v37  ;;  %v388_v9 = vmul.f32 %v2206_v14, %v385_v37  ;;  %v389_v38 = vmul.f32 %v2218_v25, %v385_v37  ;;  %v396_v13 = vmul.f32 %v2198_v10, %v395_v12 }
  0x61   :  { %v390_v1 = vadd.f32 %v386_v62, %v380_v57  ;;  %v397_v2 = vmul.f32 %v2202_v11, %v395_v12  ;;  %v398_v16 = vmul.f32 %v2208_v15, %v395_v12  ;;  %v399_v8 = vmul.f32 %v2220_v27, %v395_v12 }
  0x62   :  { %v391_v51 = vadd.f32 %v387_v56, %v381_v59  ;;  %v392_v17 = vadd.f32 %v388_v9, %v382_v53  ;;  %v393_v18 = vadd.f32 %v389_v38, %v383_v61  ;;  %v405_v20 = vstv %s2346_s14  ;;  %s2603_s14 = sld [smem:[#allocation3 + $0x37]] }
  0x63   :  { %v400_v19 = vadd.f32 %v396_v13, %v390_v1  ;;  %v423_v0 = vstv %s2348_s15  ;;  %v429_v22 = vstv %s2352_s16  ;;  %v2390_v35 = vsel %vm359_vm15, %v355_v44, %v363_v28  ;;  %s2636_s15 = sld [smem:[#allocation3 + $0x36]]  ;;  %s2645_s16 = sld [smem:[#allocation3 + $0x3b]] }
  0x64   :  { %v401_v14 = vadd.f32 %v397_v2, %v391_v51  ;;  %v402_v25 = vadd.f32 %v398_v16, %v392_v17  ;;  %v403_v23 = vadd.f32 %v399_v8, %v393_v18  ;;  %v424_v10 = vmul.f32 %v423_v0, %v2240_v60 }
  0x65   :  { %v406_v11 = vadd.f32 %v405_v20, %v400_v19  ;;  %v425_v15 = vmul.f32 %v423_v0, %v2243_v63  ;;  %v426_v24 = vmul.f32 %v423_v0, %v2245_v6  ;;  %v427_v27 = vmul.f32 %v423_v0, %v2274_v49 }
  0x66   :  { %v407_v29 = vadd.f32 %v405_v20, %v401_v14  ;;  %v408_v31 = vadd.f32 %v405_v20, %v402_v25  ;;  %v409_v3 = vadd.f32 %v405_v20, %v403_v23  ;;  %v430_v36 = vmul.f32 %v429_v22, %v2276_v50 }
  0x67   :  { %vm410_vm0 = vcmp.gt.f32.partialorder %v406_v11, 0.0  ;;  %v414_v39 = vmul.f32 0.01, %v406_v11  ;;  %v431_v40 = vmul.f32 %v429_v22, %v2278_v52  ;;  %v432_v42 = vmul.f32 %v429_v22, %v2284_v55 }
  0x68   :  { %vm411_vm1 = vcmp.gt.f32.partialorder %v407_v29, 0.0  ;;  %vm412_vm2 = vcmp.gt.f32.partialorder %v408_v31, 0.0  ;;  %v415_v41 = vmul.f32 0.01, %v407_v29  ;;  %vm413_vm3 = vcmp.gt.f32.partialorder %v409_v3, 0.0 }
  0x69   :  { %v416_v43 = vmul.f32 0.01, %v408_v31  ;;  %v417_v45 = vmul.f32 0.01, %v409_v3  ;;  %v433_v26 = vmul.f32 %v429_v22, %v2286_v58  ;;  %v2393_v54 = vsel %vm410_vm0, %v406_v11, %v414_v39 }
  0x6a   :  { %v434_v30 = vadd.f32 %v430_v36, %v424_v10  ;;  %v435_v33 = vadd.f32 %v431_v40, %v425_v15  ;;  %v436_v37 = vadd.f32 %v432_v42, %v426_v24  ;;  %v2397_v44 = vsel %vm411_vm1, %v407_v29, %v415_v41 }
  0x6b   :  { %v2399_v48 = vsel %vm412_vm2, %v408_v31, %v416_v43  ;;  %v437_v28 = vadd.f32 %v433_v26, %v427_v27  ;;  %v439_v46 = vstv %s2374_s17  ;;  %v2407_v62 = vsel %vm413_vm3, %v409_v3, %v417_v45  ;;  %s2655_s17 = sld [smem:[#allocation3 + $0x3f]] }
  0x6c   :  { %v440_v57 = vmul.f32 %v439_v46, %v2318_v4  ;;  %v441_v59 = vmul.f32 %v439_v46, %v2320_v5  ;;  %v442_v53 = vmul.f32 %v439_v46, %v2323_v7  ;;  %v443_v61 = vmul.f32 %v439_v46, %v2335_v21 }
  0x6d   :  { %v449_v56 = vstv %s2377_s18  ;;  %v459_v9 = vstv %s2382_s19  ;;  %v487_v38 = vstv %s2384_s20  ;;  %v469_v10 = vstv %s2395_s0  ;;  %s2657_s18 = sld [smem:[#allocation3 + $0x43]]  ;;  %s2663_s19 = sld [smem:[#allocation3 + $0x47]] }
  0x6e   :  { %v444_v12 = vadd.f32 %v440_v57, %v434_v30  ;;  %v445_v1 = vadd.f32 %v441_v59, %v435_v33  ;;  %v446_v13 = vadd.f32 %v442_v53, %v436_v37  ;;  %v447_v2 = vadd.f32 %v443_v61, %v437_v28  ;;  %s2695_s20 = sld [smem:[#allocation3 + $0x38]]  ;;  %s2697_s0 = sld [smem:[#allocation3 + $0x3c]] }
  0x6f   :  { %v450_v16 = vmul.f32 %v449_v56, %v2356_v47  ;;  %v451_v51 = vmul.f32 %v449_v56, %v2358_v32  ;;  %v452_v17 = vmul.f32 %v449_v56, %v2360_v34  ;;  %v453_v18 = vmul.f32 %v449_v56, %v2390_v35 }
  0x70   :  { %v460_v8 = vmul.f32 %v459_v9, %v2393_v54  ;;  %v461_v19 = vmul.f32 %v459_v9, %v2397_v44  ;;  %v462_v20 = vmul.f32 %v459_v9, %v2399_v48  ;;  %v463_v0 = vmul.f32 %v459_v9, %v2407_v62 }
  0x71   :  { %v454_v22 = vadd.f32 %v450_v16, %v444_v12  ;;  %v455_v14 = vadd.f32 %v451_v51, %v445_v1  ;;  %v456_v25 = vadd.f32 %v452_v17, %v446_v13  ;;  %v457_v23 = vadd.f32 %v453_v18, %v447_v2 }
  0x72   :  { %v488_v27 = vmul.f32 %v487_v38, %v2240_v60  ;;  %v489_v29 = vmul.f32 %v487_v38, %v2243_v63  ;;  %v493_v31 = vstv %s1938_s2  ;;  %v490_v39 = vmul.f32 %v487_v38, %v2245_v6  ;;  %s2703_s2 = sld [smem:[#allocation3 + $0x4b]] }
  0x73   :  { %v464_v11 = vadd.f32 %v460_v8, %v454_v22  ;;  %v465_v15 = vadd.f32 %v461_v19, %v455_v14  ;;  %v466_v24 = vadd.f32 %v462_v20, %v456_v25  ;;  %v467_v3 = vadd.f32 %v463_v0, %v457_v23 }
  0x74   :  { %v491_v40 = vmul.f32 %v487_v38, %v2274_v49  ;;  %v494_v42 = vmul.f32 %v493_v31, %v2276_v50  ;;  %v495_v41 = vmul.f32 %v493_v31, %v2278_v52  ;;  %v496_v43 = vmul.f32 %v493_v31, %v2284_v55 }
  0x75   :  { %v2423_v36 = vadd.f32 %v469_v10, %v464_v11  ;;  %v497_v45 = vmul.f32 %v493_v31, %v2286_v58  ;;  %v2431_v26 = vadd.f32 %v469_v10, %v465_v15  ;;  %v2433_v30 = vadd.f32 %v469_v10, %v466_v24 }
  0x76   :  { %v503_v33 = vstv %s1939_s21  ;;  %v498_v37 = vadd.f32 %v494_v42, %v488_v27  ;;  %v499_v28 = vadd.f32 %v495_v41, %v489_v29  ;;  %v500_v46 = vadd.f32 %v496_v43, %v490_v39  ;;  %s2706_s21 = sld [smem:[#allocation3 + $0x40]] }
  0x77   :  { %v501_v57 = vadd.f32 %v497_v45, %v491_v40  ;;  %v513_v59 = vstv %s1940_s22  ;;  %v473_v53 = vadd.f32 %v469_v10, %v467_v3  ;;  %vm474_vm4 = vcmp.gt.f32.partialorder %v2423_v36, 0.0  ;;  %s2721_s22 = sld [smem:[#allocation3 + $0x44]] }
  0x78   :  { %v504_v61 = vmul.f32 %v503_v33, %v2318_v4  ;;  %v523_v56 = vstv %s1941_s23  ;;  %vm475_vm5 = vcmp.gt.f32.partialorder %v2431_v26, 0.0  ;;  %vm476_vm6 = vcmp.gt.f32.partialorder %v2433_v30, 0.0  ;;  %s2731_s23 = sld [smem:[#allocation3 + $0x48]] }
  0x79   :  { %v505_v9 = vmul.f32 %v503_v33, %v2320_v5  ;;  %v506_v38 = vmul.f32 %v503_v33, %v2323_v7  ;;  %v507_v12 = vmul.f32 %v503_v33, %v2335_v21  ;;  %v514_v13 = vmul.f32 %v513_v59, %v2356_v47 }
  0x7a   :  { %v508_v1 = vadd.f32 %v504_v61, %v498_v37  ;;  %v515_v2 = vmul.f32 %v513_v59, %v2358_v32  ;;  %v516_v16 = vmul.f32 %v513_v59, %v2360_v34  ;;  %v517_v8 = vmul.f32 %v513_v59, %v2390_v35 }
  0x7b   :  { %v509_v51 = vadd.f32 %v505_v9, %v499_v28  ;;  %v510_v17 = vadd.f32 %v506_v38, %v500_v46  ;;  %v511_v18 = vadd.f32 %v507_v12, %v501_v57  ;;  %v524_v20 = vmul.f32 %v523_v56, %v2393_v54 }
  0x7c   :  { %v518_v19 = vadd.f32 %v514_v13, %v508_v1  ;;  %v525_v0 = vmul.f32 %v523_v56, %v2397_v44  ;;  %v526_v22 = vmul.f32 %v523_v56, %v2399_v48  ;;  %v527_v10 = vmul.f32 %v523_v56, %v2407_v62 }
  0x7d   :  { %v519_v14 = vadd.f32 %v515_v2, %v509_v51  ;;  %v520_v25 = vadd.f32 %v516_v16, %v510_v17  ;;  %v521_v23 = vadd.f32 %v517_v8, %v511_v18  ;;  %vm477_vm7 = vcmp.gt.f32.partialorder %v473_v53, 0.0 }
  0x7e   :  { %v528_v11 = vadd.f32 %v524_v20, %v518_v19  ;;  %v551_v15 = vstv %s2435_s24  ;;  %v557_v24 = vstv %s2437_s25  ;;  %v478_v27 = vmul.f32 0.01, %v2423_v36  ;;  %s2736_s24 = sld [smem:[#allocation3 + $0x4c]]  ;;  %s2743_s25 = sld [smem:[#allocation3 + $0x39]] }
  0x7f   :  { %v479_v29 = vmul.f32 0.01, %v2431_v26  ;;  %v529_v31 = vadd.f32 %v525_v0, %v519_v14  ;;  %v533_v3 = vstv %s2439_s26  ;;  %v480_v39 = vmul.f32 0.01, %v2433_v30  ;;  %s2752_s26 = sld [smem:[#allocation3 + $0x3d]] }
  0x80   :  { %v481_v40 = vmul.f32 0.01, %v473_v53  ;;  %v530_v42 = vadd.f32 %v526_v22, %v520_v25  ;;  %v531_v41 = vadd.f32 %v527_v10, %v521_v23  ;;  %v552_v43 = vmul.f32 %v551_v15, %v2240_v60 }
  0x81   :  { %v553_v45 = vmul.f32 %v551_v15, %v2243_v63  ;;  %v554_v33 = vmul.f32 %v551_v15, %v2245_v6  ;;  %v558_v37 = vmul.f32 %v557_v24, %v2276_v50  ;;  %v2474_v28 = vadd.f32 %v533_v3, %v528_v11 }
  0x82   :  { %v555_v46 = vmul.f32 %v551_v15, %v2274_v49  ;;  %v559_v57 = vmul.f32 %v557_v24, %v2278_v52  ;;  %v560_v59 = vmul.f32 %v557_v24, %v2284_v55  ;;  %v2482_v61 = vsel %vm474_vm4, %v2423_v36, %v478_v27 }
  0x83   :  { %v2484_v56 = vadd.f32 %v533_v3, %v529_v31  ;;  %v2489_v9 = vsel %vm475_vm5, %v2431_v26, %v479_v29  ;;  %v2494_v38 = vsel %vm476_vm6, %v2433_v30, %v480_v39  ;;  %v2496_v12 = vadd.f32 %v533_v3, %v530_v42 }
  0x84   :  { %v561_v1 = vmul.f32 %v557_v24, %v2286_v58  ;;  %v2500_v13 = vsel %vm477_vm7, %v473_v53, %v481_v40  ;;  %v562_v36 = vadd.f32 %v558_v37, %v552_v43  ;;  %v563_v2 = vadd.f32 %v559_v57, %v553_v45 }
  0x85   :  { %v564_v16 = vadd.f32 %v560_v59, %v554_v33  ;;  %v537_v26 = vadd.f32 %v533_v3, %v531_v41  ;;  %v542_v51 = vmul.f32 0.01, %v2474_v28  ;;  %v567_v17 = vstv %s2458_s27  ;;  %s2754_s27 = sld [smem:[#allocation3 + $0x41]] }
  0x86   :  { %v565_v30 = vadd.f32 %v561_v1, %v555_v46  ;;  %vm538_vm8 = vcmp.gt.f32.partialorder %v2474_v28, 0.0  ;;  %vm539_vm9 = vcmp.gt.f32.partialorder %v2484_v56, 0.0  ;;  %v568_v53 = vmul.f32 %v567_v17, %v2318_v4 }
  0x87   :  { %v569_v18 = vmul.f32 %v567_v17, %v2320_v5  ;;  %v570_v8 = vmul.f32 %v567_v17, %v2323_v7  ;;  %v571_v19 = vmul.f32 %v567_v17, %v2335_v21  ;;  %vm540_vm10 = vcmp.gt.f32.partialorder %v2496_v12, 0.0 }
  0x88   :  { %v577_v20 = vstv %s2460_s28  ;;  %v587_v0 = vstv %s2465_s29  ;;  %v615_v22 = vstv %s2468_s30  ;;  %v572_v14 = vadd.f32 %v568_v53, %v562_v36  ;;  %s2758_s28 = sld [smem:[#allocation3 + $0x45]]  ;;  %s2783_s29 = sld [smem:[#allocation3 + $0x49]] }
  0x89   :  { %v573_v25 = vadd.f32 %v569_v18, %v563_v2  ;;  %v574_v23 = vadd.f32 %v570_v8, %v564_v16  ;;  %v575_v10 = vadd.f32 %v571_v19, %v565_v30  ;;  %v578_v11 = vmul.f32 %v577_v20, %v2356_v47  ;;  %s2794_s30 = sld [smem:[#allocation3 + $0x3a]] }
  0x8a   :  { %v579_v15 = vmul.f32 %v577_v20, %v2358_v32  ;;  %v580_v24 = vmul.f32 %v577_v20, %v2360_v34  ;;  %v581_v27 = vmul.f32 %v577_v20, %v2390_v35  ;;  %v588_v29 = vmul.f32 %v587_v0, %v2393_v54 }
  0x8b   :  { %v589_v31 = vmul.f32 %v587_v0, %v2397_v44  ;;  %v590_v3 = vmul.f32 %v587_v0, %v2399_v48  ;;  %v591_v39 = vmul.f32 %v587_v0, %v2407_v62  ;;  %v582_v40 = vadd.f32 %v578_v11, %v572_v14 }
  0x8c   :  { %v583_v42 = vadd.f32 %v579_v15, %v573_v25  ;;  %v584_v41 = vadd.f32 %v580_v24, %v574_v23  ;;  %v585_v43 = vadd.f32 %v581_v27, %v575_v10  ;;  %vm541_vm11 = vcmp.gt.f32.partialorder %v537_v26, 0.0 }
  0x8d   :  { %v543_v45 = vmul.f32 0.01, %v2484_v56  ;;  %v544_v33 = vmul.f32 0.01, %v2496_v12  ;;  %v597_v37 = vstv %s2502_s4  ;;  %v545_v46 = vmul.f32 0.01, %v537_v26 }
  0x8e   :  { %v592_v57 = vadd.f32 %v588_v29, %v582_v40  ;;  %v593_v59 = vadd.f32 %v589_v31, %v583_v42  ;;  %v594_v1 = vadd.f32 %v590_v3, %v584_v41  ;;  %v616_v36 = vmul.f32 %v615_v22, %v2240_v60  ;;  %s2800_s4 = sld [smem:[#allocation3 + $0x4d]] }
  0x8f   :  { %v617_v2 = vmul.f32 %v615_v22, %v2243_v63  ;;  %v618_v16 = vmul.f32 %v615_v22, %v2245_v6  ;;  %v621_v30 = vstv %s2512_s5  ;;  %v595_v17 = vadd.f32 %v591_v39, %v585_v43  ;;  %s2802_s5 = sld [smem:[#allocation3 + $0x3e]] }
  0x90   :  { %v2539_v53 = vadd.f32 %v597_v37, %v592_v57  ;;  %v2541_v18 = vadd.f32 %v597_v37, %v593_v59  ;;  %v619_v8 = vmul.f32 %v615_v22, %v2274_v49  ;;  %v622_v19 = vmul.f32 %v621_v30, %v2276_v50 }
  0x91   :  { %v623_v20 = vmul.f32 %v621_v30, %v2278_v52  ;;  %v624_v0 = vmul.f32 %v621_v30, %v2284_v55  ;;  %v625_v14 = vmul.f32 %v621_v30, %v2286_v58  ;;  %v2551_v25 = vsel %vm538_vm8, %v2474_v28, %v542_v51 }
  0x92   :  { %v2556_v23 = vsel %vm539_vm9, %v2484_v56, %v543_v45  ;;  %v2558_v22 = vadd.f32 %v597_v37, %v594_v1  ;;  %v631_v10 = vstv %s2522_s6  ;;  %v2566_v11 = vsel %vm540_vm10, %v2496_v12, %v544_v33  ;;  %s2815_s6 = sld [smem:[#allocation3 + $0x42]] }
  0x93   :  { %v2569_v15 = vsel %vm541_vm11, %v537_v26, %v545_v46  ;;  %v626_v28 = vadd.f32 %v622_v19, %v616_v36  ;;  %v641_v51 = vstv %s2528_s7  ;;  %v627_v56 = vadd.f32 %v623_v20, %v617_v2  ;;  %s2822_s7 = sld [smem:[#allocation3 + $0x46]] }
  0x94   :  { %v628_v24 = vadd.f32 %v624_v0, %v618_v16  ;;  %v629_v27 = vadd.f32 %v625_v14, %v619_v8  ;;  %v651_v29 = vstv %s2530_s8  ;;  %v601_v31 = vadd.f32 %v597_v37, %v595_v17  ;;  %s2824_s8 = sld [smem:[#allocation3 + $0x4a]] }
  0x95   :  { %vm602_vm12 = vcmp.gt.f32.partialorder %v2539_v53, 0.0  ;;  %vm603_vm13 = vcmp.gt.f32.partialorder %v2541_v18, 0.0  ;;  %v632_v12 = vmul.f32 %v631_v10, %v2318_v4  ;;  %vm604_vm14 = vcmp.gt.f32.partialorder %v2558_v22, 0.0 }
  0x96   :  { %v606_v26 = vmul.f32 0.01, %v2539_v53  ;;  %v633_v3 = vmul.f32 %v631_v10, %v2320_v5  ;;  %v634_v39 = vmul.f32 %v631_v10, %v2323_v7  ;;  %v635_v40 = vmul.f32 %v631_v10, %v2335_v21 }
  0x97   :  { %v636_v42 = vadd.f32 %v632_v12, %v626_v28  ;;  %v642_v41 = vmul.f32 %v641_v51, %v2356_v47  ;;  %v643_v43 = vmul.f32 %v641_v51, %v2358_v32  ;;  %v644_v45 = vmul.f32 %v641_v51, %v2360_v34 }
  0x98   :  { %v637_v33 = vadd.f32 %v633_v3, %v627_v56  ;;  %v638_v37 = vadd.f32 %v634_v39, %v628_v24  ;;  %v639_v46 = vadd.f32 %v635_v40, %v629_v27  ;;  %v645_v57 = vmul.f32 %v641_v51, %v2390_v35 }
  0x99   :  { %v646_v59 = vadd.f32 %v642_v41, %v636_v42  ;;  %v652_v1 = vmul.f32 %v651_v29, %v2393_v54  ;;  %v653_v36 = vmul.f32 %v651_v29, %v2397_v44  ;;  %v654_v2 = vmul.f32 %v651_v29, %v2399_v48 }
  0x9a   :  { %v647_v16 = vadd.f32 %v643_v43, %v637_v33  ;;  %v648_v30 = vadd.f32 %v644_v45, %v638_v37  ;;  %v649_v17 = vadd.f32 %v645_v57, %v639_v46  ;;  %v655_v8 = vmul.f32 %v651_v29, %v2407_v62 }
  0x9b   :  { %v656_v19 = vadd.f32 %v652_v1, %v646_v59  ;;  %v661_v20 = vstv %s2561_s1  ;;  %v679_v0 = vstv %s2572_s9  ;;  %v685_v14 = vstv %s2574_s10  ;;  %s2836_s1 = sld [smem:[#allocation3 + $0x4e]] }
  0x9c   :  { %v607_v10 = vmul.f32 0.01, %v2541_v18  ;;  %v657_v28 = vadd.f32 %v653_v36, %v647_v16  ;;  %v658_v51 = vadd.f32 %v654_v2, %v648_v30  ;;  %v659_v56 = vadd.f32 %v655_v8, %v649_v17 }
  0x9d   :  { %vm605_vm15 = vcmp.gt.f32.partialorder %v601_v31, 0.0  ;;  %v608_v24 = vmul.f32 0.01, %v2558_v22  ;;  %v609_v27 = vmul.f32 0.01, %v601_v31  ;;  %v662_v29 = vadd.f32 %v661_v20, %v656_v19 }
  0x9e   :  { %v680_v12 = vmul.f32 %v679_v0, %v2240_v60  ;;  %v681_v3 = vmul.f32 %v679_v0, %v2243_v63  ;;  %v682_v39 = vmul.f32 %v679_v0, %v2245_v6  ;;  %v686_v40 = vmul.f32 %v685_v14, %v2276_v50 }
  0x9f   :  { %v663_v42 = vadd.f32 %v661_v20, %v657_v28  ;;  %v683_v41 = vmul.f32 %v679_v0, %v2274_v49  ;;  %v687_v43 = vmul.f32 %v685_v14, %v2278_v52  ;;  %v688_v45 = vmul.f32 %v685_v14, %v2284_v55 }
  0xa0   :  { %v2616_v33 = vsel %vm602_vm12, %v2539_v53, %v606_v26  ;;  %v2621_v60 = vsel %vm603_vm13, %v2541_v18, %v607_v10  ;;  %v2623_v63 = vadd.f32 %v661_v20, %v658_v51  ;;  %v2625_v6 = vadd.f32 %v661_v20, %v659_v56 }
  0xa1   :  { %v2630_v49 = vsel %vm604_vm14, %v2558_v22, %v608_v24  ;;  %v2633_v50 = vsel %vm605_vm15, %v601_v31, %v609_v27  ;;  %vm666_vm0 = vcmp.gt.f32.partialorder %v662_v29, 0.0  ;;  %v689_v52 = vmul.f32 %v685_v14, %v2286_v58 }
  0xa2   :  { %v670_v55 = vmul.f32 0.01, %v662_v29  ;;  %v690_v53 = vadd.f32 %v686_v40, %v680_v12  ;;  %v691_v18 = vadd.f32 %v687_v43, %v681_v3  ;;  %v692_v26 = vadd.f32 %v688_v45, %v682_v39 }
  0xa3   :  { %vm667_vm1 = vcmp.gt.f32.partialorder %v663_v42, 0.0  ;;  %v671_v37 = vmul.f32 0.01, %v663_v42  ;;  %v693_v46 = vadd.f32 %v689_v52, %v683_v41  ;;  %v695_v22 = vstv %s2596_s11 }
  0xa4   :  { %vm668_vm2 = vcmp.gt.f32.partialorder %v2623_v63, 0.0  ;;  %vm669_vm3 = vcmp.gt.f32.partialorder %v2625_v6, 0.0  ;;  %v696_v31 = vmul.f32 %v695_v22, %v2318_v4  ;;  %v697_v58 = vmul.f32 %v695_v22, %v2320_v5 }
  0xa5   :  { %v698_v57 = vmul.f32 %v695_v22, %v2323_v7  ;;  %v699_v59 = vmul.f32 %v695_v22, %v2335_v21  ;;  %v672_v1 = vmul.f32 0.01, %v2623_v63  ;;  %v705_v36 = vstv %s2598_s12 }
  0xa6   :  { %v715_v2 = vstv %s2601_s13  ;;  %v743_v16 = vstv %s2603_s14  ;;  %v700_v30 = vadd.f32 %v696_v31, %v690_v53  ;;  %v701_v17 = vadd.f32 %v697_v58, %v691_v18 }
  0xa7   :  { %v702_v8 = vadd.f32 %v698_v57, %v692_v26  ;;  %v703_v19 = vadd.f32 %v699_v59, %v693_v46  ;;  %v706_v20 = vmul.f32 %v705_v36, %v2356_v47  ;;  %v707_v4 = vmul.f32 %v705_v36, %v2358_v32 }
  0xa8   :  { %v708_v5 = vmul.f32 %v705_v36, %v2360_v34  ;;  %v709_v7 = vmul.f32 %v705_v36, %v2390_v35  ;;  %v716_v21 = vmul.f32 %v715_v2, %v2393_v54  ;;  %v717_v0 = vmul.f32 %v715_v2, %v2397_v44 }
  0xa9   :  { %v718_v14 = vmul.f32 %v715_v2, %v2399_v48  ;;  %v719_v10 = vmul.f32 %v715_v2, %v2407_v62  ;;  %v710_v47 = vadd.f32 %v706_v20, %v700_v30  ;;  %v711_v32 = vadd.f32 %v707_v4, %v701_v17 }
  0xaa   :  { %v712_v34 = vadd.f32 %v708_v5, %v702_v8  ;;  %v713_v28 = vadd.f32 %v709_v7, %v703_v19  ;;  %v673_v35 = vmul.f32 0.01, %v2625_v6  ;;  %v2667_v51 = vsel %vm666_vm0, %v662_v29, %v670_v55 }
  0xab   :  { %v2670_v54 = vsel %vm667_vm1, %v663_v42, %v671_v37  ;;  %v725_v44 = vstv %s2636_s15  ;;  %v720_v56 = vadd.f32 %v716_v21, %v710_v47  ;;  %v721_v48 = vadd.f32 %v717_v0, %v711_v32 }
  0xac   :  { %v722_v24 = vadd.f32 %v718_v14, %v712_v34  ;;  %v744_v62 = vmul.f32 %v743_v16, %v2482_v61  ;;  %v723_v27 = vadd.f32 %v719_v10, %v713_v28  ;;  %v745_v12 = vmul.f32 %v743_v16, %v2489_v9 }
  0xad   :  { %v746_v3 = vmul.f32 %v743_v16, %v2494_v38  ;;  %v749_v39 = vstv %s2645_s16  ;;  %v726_v29 = vadd.f32 %v725_v44, %v720_v56  ;;  %v727_v40 = vadd.f32 %v725_v44, %v721_v48 }
  0xae   :  { %v728_v41 = vadd.f32 %v725_v44, %v722_v24  ;;  %v747_v42 = vmul.f32 %v743_v16, %v2500_v13  ;;  %v750_v43 = vmul.f32 %v749_v39, %v2551_v25  ;;  %v751_v45 = vmul.f32 %v749_v39, %v2556_v23 }
  0xaf   :  { %v752_v52 = vmul.f32 %v749_v39, %v2566_v11  ;;  %v753_v55 = vmul.f32 %v749_v39, %v2569_v15  ;;  %v2685_v53 = vsel %vm668_vm2, %v2623_v63, %v672_v1  ;;  %v2690_v18 = vsel %vm669_vm3, %v2625_v6, %v673_v35 }
  0xb0   :  { %v759_v26 = vstv %s2655_s17  ;;  %v769_v37 = vstv %s2657_s18  ;;  %v729_v46 = vadd.f32 %v725_v44, %v723_v27  ;;  %vm730_vm4 = vcmp.gt.f32.partialorder %v726_v29, 0.0 }
  0xb1   :  { %v754_v22 = vadd.f32 %v750_v43, %v744_v62  ;;  %v779_v31 = vstv %s2663_s19  ;;  %vm731_vm5 = vcmp.gt.f32.partialorder %v727_v40, 0.0  ;;  %vm732_vm6 = vcmp.gt.f32.partialorder %v728_v41, 0.0 }
  0xb2   :  { %v755_v58 = vadd.f32 %v751_v45, %v745_v12  ;;  %v756_v63 = vadd.f32 %v752_v52, %v746_v3  ;;  %v734_v57 = vmul.f32 0.01, %v726_v29  ;;  %v735_v59 = vmul.f32 0.01, %v727_v40 }
  0xb3   :  { %v757_v1 = vadd.f32 %v753_v55, %v747_v42  ;;  %v760_v6 = vmul.f32 %v759_v26, %v2616_v33  ;;  %v736_v36 = vmul.f32 0.01, %v728_v41  ;;  %v761_v2 = vmul.f32 %v759_v26, %v2621_v60 }
  0xb4   :  { %v762_v16 = vmul.f32 %v759_v26, %v2630_v49  ;;  %v763_v30 = vmul.f32 %v759_v26, %v2633_v50  ;;  %vm733_vm7 = vcmp.gt.f32.partialorder %v729_v46, 0.0  ;;  %v737_v17 = vmul.f32 0.01, %v729_v46 }
  0xb5   :  { %v764_v8 = vadd.f32 %v760_v6, %v754_v22  ;;  %v770_v19 = vmul.f32 %v769_v37, %v2667_v51  ;;  %v765_v20 = vadd.f32 %v761_v2, %v755_v58  ;;  %v771_v5 = vmul.f32 %v769_v37, %v2670_v54 }
  0xb6   :  { %v766_v4 = vadd.f32 %v762_v16, %v756_v63  ;;  %v772_v7 = vmul.f32 %v769_v37, %v2685_v53  ;;  %v2711_v21 = vsel %vm730_vm4, %v726_v29, %v734_v57  ;;  %v767_v0 = vadd.f32 %v763_v30, %v757_v1 }
  0xb7   :  { %v773_v14 = vmul.f32 %v769_v37, %v2690_v18  ;;  %v2715_v10 = vsel %vm731_vm5, %v727_v40, %v735_v59  ;;  %v2718_v47 = vsel %vm732_vm6, %v728_v41, %v736_v36  ;;  %v774_v32 = vadd.f32 %v770_v19, %v764_v8 }
  0xb8   :  { %v780_v34 = vmul.f32 %v779_v31, %v2711_v21  ;;  %v2724_v28 = vsel %vm733_vm7, %v729_v46, %v737_v17  ;;  %v781_v35 = vmul.f32 %v779_v31, %v2715_v10  ;;  %v795_v44 = vstv %s2695_s20 }
  0xb9   :  { %v801_v56 = vstv %s2697_s0  ;;  %v775_v48 = vadd.f32 %v771_v5, %v765_v20  ;;  %v776_v24 = vadd.f32 %v772_v7, %v766_v4  ;;  %v782_v62 = vmul.f32 %v779_v31, %v2718_v47 }
  0xba   :  { %v796_v27 = vmul.f32 %v795_v44, %v2482_v61  ;;  %v777_v12 = vadd.f32 %v773_v14, %v767_v0  ;;  %v783_v3 = vmul.f32 %v779_v31, %v2724_v28  ;;  %v797_v39 = vmul.f32 %v795_v44, %v2489_v9 }
  0xbb   :  { %v798_v29 = vmul.f32 %v795_v44, %v2494_v38  ;;  %v784_v40 = vadd.f32 %v780_v34, %v774_v32  ;;  %v2739_v41 = vstv %s2703_s2  ;;  %v799_v42 = vmul.f32 %v795_v44, %v2500_v13 }
  0xbc   :  { %v802_v43 = vmul.f32 %v801_v56, %v2551_v25  ;;  %v803_v45 = vmul.f32 %v801_v56, %v2556_v23  ;;  %v804_v52 = vmul.f32 %v801_v56, %v2566_v11  ;;  %v805_v55 = vmul.f32 %v801_v56, %v2569_v15 }
  0xbd   :  { %v811_v26 = vstv %s2706_s21  ;;  %v785_v37 = vadd.f32 %v781_v35, %v775_v48  ;;  %v786_v58 = vadd.f32 %v782_v62, %v776_v24  ;;  %v821_v36 = vstv %s2721_s22 }
  0xbe   :  { %v806_v46 = vadd.f32 %v802_v43, %v796_v27  ;;  %v812_v22 = vmul.f32 %v811_v26, %v2616_v33  ;;  %v813_v31 = vmul.f32 %v811_v26, %v2621_v60  ;;  %v807_v63 = vadd.f32 %v803_v45, %v797_v39 }
  0xbf   :  { %v808_v57 = vadd.f32 %v804_v52, %v798_v29  ;;  %v814_v59 = vmul.f32 %v811_v26, %v2630_v49  ;;  %v809_v1 = vadd.f32 %v805_v55, %v799_v42  ;;  %v815_v6 = vmul.f32 %v811_v26, %v2633_v50 }
  0xc0   :  { %v2760_v2 = vadd.f32 %v783_v3, %v777_v12  ;;  %v816_v16 = vadd.f32 %v812_v22, %v806_v46  ;;  %v822_v30 = vmul.f32 %v821_v36, %v2667_v51  ;;  %v2764_v17 = vadd.f32 %v2739_v41, %v784_v40 }
  0xc1   :  { %v817_v8 = vadd.f32 %v813_v31, %v807_v63  ;;  %v823_v19 = vmul.f32 %v821_v36, %v2670_v54  ;;  %v831_v20 = vstv %s2731_s23  ;;  %v2769_v4 = vadd.f32 %v2739_v41, %v785_v37 }
  0xc2   :  { %v2772_v5 = vadd.f32 %v2739_v41, %v786_v58  ;;  %v818_v7 = vadd.f32 %v814_v59, %v808_v57  ;;  %v2775_v0 = vstv %s2736_s24  ;;  %v819_v14 = vadd.f32 %v815_v6, %v809_v1 }
  0xc3   :  { %v824_v32 = vmul.f32 %v821_v36, %v2685_v53  ;;  %v825_v34 = vmul.f32 %v821_v36, %v2690_v18  ;;  %v847_v35 = vstv %s2743_s25  ;;  %v826_v44 = vadd.f32 %v822_v30, %v816_v16 }
  0xc4   :  { %v832_v56 = vmul.f32 %v831_v20, %v2711_v21  ;;  %v833_v48 = vmul.f32 %v831_v20, %v2715_v10  ;;  %v834_v24 = vmul.f32 %v831_v20, %v2718_v47  ;;  %v827_v62 = vadd.f32 %v823_v19, %v817_v8 }
  0xc5   :  { %v2786_v27 = vmul.f32 %v831_v20, %v2724_v28  ;;  %v848_v12 = vmul.f32 %v847_v35, %v2482_v61  ;;  %v849_v3 = vmul.f32 %v847_v35, %v2489_v9  ;;  %v850_v39 = vmul.f32 %v847_v35, %v2494_v38 }
  0xc6   :  { %v851_v29 = vmul.f32 %v847_v35, %v2500_v13  ;;  %v853_v40 = vstv %s2752_s26  ;;  %v863_v42 = vstv %s2754_s27  ;;  %v828_v43 = vadd.f32 %v824_v32, %v818_v7 }
  0xc7   :  { %v2796_v45 = vadd.f32 %v825_v34, %v819_v14  ;;  %v854_v52 = vmul.f32 %v853_v40, %v2551_v25  ;;  %v873_v55 = vstv %s2758_s28  ;;  %v855_v26 = vmul.f32 %v853_v40, %v2556_v23 }
  0xc8   :  { %v856_v37 = vmul.f32 %v853_v40, %v2566_v11  ;;  %v857_v46 = vmul.f32 %v853_v40, %v2569_v15  ;;  %v864_v22 = vmul.f32 %v863_v42, %v2616_v33  ;;  %v865_v58 = vmul.f32 %v863_v42, %v2621_v60 }
  0xc9   :  { %v858_v31 = vadd.f32 %v854_v52, %v848_v12  ;;  %v866_v63 = vmul.f32 %v863_v42, %v2630_v49  ;;  %v867_v57 = vmul.f32 %v863_v42, %v2633_v50  ;;  %v859_v59 = vadd.f32 %v855_v26, %v849_v3 }
  0xca   :  { %v860_v1 = vadd.f32 %v856_v37, %v850_v39  ;;  %v861_v6 = vadd.f32 %v857_v46, %v851_v29  ;;  %v874_v36 = vmul.f32 %v873_v55, %v2667_v51  ;;  %v875_v30 = vmul.f32 %v873_v55, %v2670_v54 }
  0xcb   :  { %v868_v16 = vadd.f32 %v864_v22, %v858_v31  ;;  %v876_v8 = vmul.f32 %v873_v55, %v2685_v53  ;;  %v877_v19 = vmul.f32 %v873_v55, %v2690_v18  ;;  %v869_v20 = vadd.f32 %v865_v58, %v859_v59 }
  0xcc   :  { %v870_v7 = vadd.f32 %v866_v63, %v860_v1  ;;  %v871_v14 = vadd.f32 %v867_v57, %v861_v6  ;;  %v883_v32 = vstv %s2783_s29  ;;  %v893_v55 = vstv %s2800_s4 }
  0xcd   :  { %v878_v34 = vadd.f32 %v874_v36, %v868_v16  ;;  %v884_v35 = vmul.f32 %v883_v32, %v2711_v21  ;;  %v885_v12 = vmul.f32 %v883_v32, %v2715_v10  ;;  %v886_v3 = vmul.f32 %v883_v32, %v2718_v47 }
  0xce   :  { %v879_v39 = vadd.f32 %v875_v30, %v869_v20  ;;  %v880_v29 = vadd.f32 %v876_v8, %v870_v7  ;;  %v881_v40 = vadd.f32 %v877_v19, %v871_v14  ;;  %v887_v42 = vmul.f32 %v883_v32, %v2724_v28 }
  0xcf   :  { %v888_v52 = vadd.f32 %v884_v35, %v878_v34  ;;  %v899_v26 = vstv %s2794_s30  ;;  %v905_v37 = vstv %s2802_s5  ;;  %v836_v46 = vadd.f32 %v832_v56, %v826_v44 }
  0xd0   :  { %v837_v22 = vadd.f32 %v833_v48, %v827_v62  ;;  %v2829_v31 = vadd.f32 %v834_v24, %v828_v43  ;;  %v900_v58 = vmul.f32 %v899_v26, %v2482_v61  ;;  %v889_v63 = vadd.f32 %v885_v12, %v879_v39 }
  0xd1   :  { %v901_v57 = vmul.f32 %v899_v26, %v2489_v9  ;;  %v902_v59 = vmul.f32 %v899_v26, %v2494_v38  ;;  %v903_v1 = vmul.f32 %v899_v26, %v2500_v13  ;;  %v890_v6 = vadd.f32 %v886_v3, %v880_v29 }
  0xd2   :  { %v891_v36 = vadd.f32 %v887_v42, %v881_v40  ;;  %v894_v16 = vadd.f32 %v893_v55, %v888_v52  ;;  %v906_v30 = vmul.f32 %v905_v37, %v2551_v25  ;;  %v907_v44 = vmul.f32 %v905_v37, %v2556_v23 }
  0xd3   :  { %v908_v61 = vmul.f32 %v905_v37, %v2566_v11  ;;  %v909_v56 = vmul.f32 %v905_v37, %v2569_v15  ;;  %v915_v9 = vstv %s2815_s6  ;;  %v895_v19 = vadd.f32 %v893_v55, %v889_v63 }
  0xd4   :  { %v910_v48 = vadd.f32 %v906_v30, %v900_v58  ;;  %v916_v38 = vmul.f32 %v915_v9, %v2616_v33  ;;  %v917_v13 = vmul.f32 %v915_v9, %v2621_v60  ;;  %v918_v24 = vmul.f32 %v915_v9, %v2630_v49 }
  0xd5   :  { %v911_v62 = vadd.f32 %v907_v44, %v901_v57  ;;  %v912_v25 = vadd.f32 %v908_v61, %v902_v59  ;;  %v913_v43 = vadd.f32 %v909_v56, %v903_v1  ;;  %v919_v8 = vmul.f32 %v915_v9, %v2633_v50 }
  0xd6   :  { %v920_v20 = vadd.f32 %v916_v38, %v910_v48  ;;  %v925_v23 = vstv %s2822_s7  ;;  %v935_v7 = vstv %s2824_s8  ;;  %v945_v42 = vstv %s2836_s1 }
  0xd7   :  { %v921_v11 = vadd.f32 %v917_v13, %v911_v62  ;;  %v922_v15 = vadd.f32 %v918_v24, %v912_v25  ;;  %v923_v14 = vadd.f32 %v919_v8, %v913_v43  ;;  %v926_v32 = vmul.f32 %v925_v23, %v2667_v51 }
  0xd8   :  { %v927_v33 = vmul.f32 %v925_v23, %v2670_v54  ;;  %v928_v60 = vmul.f32 %v925_v23, %v2685_v53  ;;  %v929_v49 = vmul.f32 %v925_v23, %v2690_v18  ;;  %v936_v34 = vmul.f32 %v935_v7, %v2711_v21 }
  0xd9   :  { %v930_v35 = vadd.f32 %v926_v32, %v920_v20  ;;  %v937_v50 = vmul.f32 %v935_v7, %v2715_v10  ;;  %v938_v12 = vmul.f32 %v935_v7, %v2718_v47  ;;  %v939_v3 = vmul.f32 %v935_v7, %v2724_v28 }
  0xda   :  { %v931_v39 = vadd.f32 %v927_v33, %v921_v11  ;;  %v932_v29 = vadd.f32 %v928_v60, %v922_v15  ;;  %v933_v40 = vadd.f32 %v929_v49, %v923_v14  ;;  %v839_v51 = vadd.f32 %v2786_v27, %v2796_v45 }
  0xdb   :  { %v896_v54 = vadd.f32 %v893_v55, %v890_v6  ;;  %v940_v53 = vadd.f32 %v936_v34, %v930_v35  ;;  %v1042_v52 = vlaneseq  ;;  %v897_v18 = vadd.f32 %v893_v55, %v891_v36 }
  0xdc   :  { %v941_v26 = vadd.f32 %v937_v50, %v931_v39  ;;  %v942_v21 = vadd.f32 %v938_v12, %v932_v29  ;;  %v943_v37 = vadd.f32 %v939_v3, %v933_v40  ;;  %v2861_v10 = vadd.f32 %v2739_v41, %v2760_v2 }
  0xdd   :  { %v2863_v47 = vadd.f32 %v945_v42, %v940_v53  ;;  %2002 = vtanh.f32 %v894_v16  ;;  %v1043_v28 = vshrl.u32 %v1042_v52, 7  ;;  %v2872_v45 = vadd.f32 %v2775_v0, %v836_v46 }
  0xde   :  { %v2865_v58 = vadd.f32 %v945_v42, %v941_v26  ;;  %v2867_v63 = vadd.f32 %v945_v42, %v942_v21  ;;  %v2869_v27 = vadd.f32 %v945_v42, %v943_v37  ;;  %2004 = vtanh.f32 %v895_v19 }
  0xdf   :  { %v2875_v55 = vadd.f32 %v2775_v0, %v837_v22  ;;  %2006 = vtanh.f32 %v896_v54  ;;  %v966_v41 = vand.u32 2147483647, %v2863_v47  ;;  %v2880_v2 = vadd.f32 %v2775_v0, %v2829_v31 }
  0xe0   :  { %v2883_v57 = vadd.f32 %v2775_v0, %v839_v51  ;;  %2008 = vtanh.f32 %v897_v18  ;;  %v954_v59 = vmax.f32 %v2863_v47, 0.0  ;;  %v955_v1 = vmax.f32 %v2865_v58, 0.0 }
  0xe1   :  { %v967_v46 = vand.u32 2147483647, %v2865_v58  ;;  %v968_v22 = vand.u32 2147483647, %v2867_v63  ;;  %v2889_v6 = vsub.s32 0, %v1043_v28  ;;  %v956_v36 = vmax.f32 %v2867_v63, 0.0 }
  0xe2   :  { %v969_v16 = vand.u32 2147483647, %v2869_v27  ;;  %v970_v31 = vsub.f32 0.0, %v966_v41  ;;  %v2893_v30 = vsub.s32 1, %v1043_v28  ;;  %v2895_v61 = vsub.s32 2, %v1043_v28 }
  0xe3   :  { %v971_v0 = vsub.f32 0.0, %v967_v46  ;;  %v972_v44 = vsub.f32 0.0, %v968_v22  ;;  %v2897_v56 = vsub.s32 3, %v1043_v28  ;;  %v957_v9 = vmax.f32 %v2869_v27, 0.0 }
  0xe4   :  { %v973_v48 = vsub.f32 0.0, %v969_v16  ;;  %v974_v38 = vmul.f32 1.442695, %v970_v31  ;;  %v2900_v13 = vsub.s32 4, %v1043_v28  ;;  %v1045_v25 = vrot.slane %v2764_v17, %v2889_v6 }
  0xe5   :  { %v976_v24 = vmul.f32 1.442695, %v971_v0  ;;  %v978_v62 = vmul.f32 1.442695, %v972_v44  ;;  %v1049_v43 = vrot.slane %v2764_v17, %v2893_v30  ;;  %v1053_v19 = vrot.slane %v2764_v17, %v2895_v61 }
  0xe6   :  { %2010 = vpow2.f32 %v974_v38  ;;  %v980_v8 = vmul.f32 1.442695, %v973_v48  ;;  %v2908_v20 = vsub.s32 5, %v1043_v28  ;;  %v1057_v7 = vrot.slane %v2764_v17, %v2897_v56 }
  0xe7   :  { %v2910_v23 = vpop.eup %2002  ;;  %2012 = vpow2.f32 %v976_v24  ;;  %v2914_v11 = vsub.s32 6, %v1043_v28  ;;  %v2916_v15 = vsub.s32 7, %v1043_v28  ;;  %v1061_v32 = vrot.slane %v2764_v17, %v2900_v13 }
  0xe8   :  { %v2918_v14 = vpop.eup %2004  ;;  %2014 = vpow2.f32 %v978_v62  ;;  %v1065_v33 = vrot.slane %v2764_v17, %v2908_v20  ;;  %v1209_v38 = vrot.slane %v2872_v45, %v2889_v6  ;;  %v1213_v24 = vrot.slane %v2872_v45, %v2893_v30 }
  0xe9   :  { %v2926_v49 = vpop.eup %2006  ;;  %2016 = vpow2.f32 %v980_v8  ;;  %v1069_v34 = vrot.slane %v2764_v17, %v2914_v11  ;;  %v1217_v8 = vrot.slane %v2872_v45, %v2895_v61  ;;  %v1221_v31 = vrot.slane %v2872_v45, %v2897_v56 }
  0xea   :  { %v2934_v12 = vpop.eup %2008  ;;  %v1225_v0 = vrot.slane %v2872_v45, %v2900_v13  ;;  %v1229_v44 = vrot.slane %v2872_v45, %v2908_v20  ;;  %v1233_v41 = vrot.slane %v2872_v45, %v2914_v11  ;;  %v1237_v18 = vrot.slane %v2872_v45, %v2916_v15 }
  0xeb   :  { %v1245_v29 = vrot.slane %v2875_v55, %v2893_v30  ;;  %vm958_vm11 = vcmp.ne.f32.partialorder %v2863_v47, %v2863_v47  ;;  %vm959_vm12 = vcmp.ne.f32.partialorder %v2865_v58, %v2865_v58  ;;  %vm960_vm14 = vcmp.ne.f32.partialorder %v2867_v63, %v2867_v63 }
  0xec   :  { %vm961_vm15 = vcmp.ne.f32.partialorder %v2869_v27, %v2869_v27  ;;  %vm1694_vm0 = vcmask 1040384   ;;  %vm1727_vm1 = vcmask 1041408   ;;  %vm1760_vm2 = vcmask 1042432  }
  0xf0   :  { %v2011_v62 = vpop.eup %2010 }
  0xf1   :  { %v2013_v48 = vpop.eup %2012  ;;  %v982_v16 = vadd.f32 1.0, %v2011_v62  ;;  %v985_v22 = vmul.f32 -0.5, %v2011_v62  ;;  %v988_v46 = vand.u32 2147483647, %v2011_v62 }
  0xf2   :  { %v2015_v28 = vpop.eup %2014  ;;  %v991_v37 = vadd.f32 1.0, %v2013_v48  ;;  %v994_v21 = vmul.f32 -0.5, %v2013_v48  ;;  %v997_v26 = vand.u32 2147483647, %v2013_v48 }
  0xf3   :  { %v2017_v52 = vpop.eup %2016  ;;  %2018 = vlog2.f32 %v982_v16  ;;  %v986_v53 = vadd.f32 1.0, %v985_v22  ;;  %v1000_v54 = vadd.f32 1.0, %v2015_v28  ;;  %v1003_v40 = vmul.f32 -0.5, %v2015_v28 }
  0xf4   :  { %2020 = vlog2.f32 %v991_v37  ;;  %v995_v42 = vadd.f32 1.0, %v994_v21  ;;  %vm3000_vm8 = vcmp.lt.f32.partialorder %v988_v46, 0.0004427343  ;;  %v1006_v50 = vand.u32 2147483647, %v2015_v28 }
  0xf5   :  { %2022 = vlog2.f32 %v1000_v54  ;;  %v1009_v35 = vadd.f32 1.0, %v2017_v52  ;;  %v987_v60 = vmul.f32 %v2011_v62, %v986_v53  ;;  %vm3004_vm9 = vcmp.lt.f32.partialorder %v997_v26, 0.0004427343 }
  0xf6   :  { %v1004_v16 = vadd.f32 1.0, %v1003_v40  ;;  %v1012_v51 = vmul.f32 -0.5, %v2017_v52  ;;  %v1015_v37 = vand.u32 2147483647, %v2017_v52  ;;  %v996_v21 = vmul.f32 %v2013_v48, %v995_v42 }
  0xf7   :  { %vm3008_vm10 = vcmp.lt.f32.partialorder %v1006_v50, 0.0004427343  ;;  %2024 = vlog2.f32 %v1009_v35  ;;  %v1249_v46 = vrot.slane %v2875_v55, %v2895_v61  ;;  %v1413_v22 = vrot.slane %v2918_v14, %v2895_v61 }
  0xf8   :  { %v1005_v54 = vmul.f32 %v2015_v28, %v1004_v16  ;;  %v1013_v53 = vadd.f32 1.0, %v1012_v51  ;;  %vm3022_vm13 = vcmp.lt.f32.partialorder %v1015_v37, 0.0004427343  ;;  %v1397_v51 = vrot.slane %v2910_v23, %v2914_v11 }
  0xf9   :  { %v1401_v28 = vrot.slane %v2910_v23, %v2916_v15  ;;  %v3821_v50 = vrot.slane %v2883_v57, %v2916_v15 }
  0xfa   :  { %v1014_v48 = vmul.f32 %v2017_v52, %v1013_v53 }
  0xfd   :  { %v2019_v16 = vpop.eup %2018 }
  0xfe   :  { %v2021_v37 = vpop.eup %2020  ;;  %v984_v35 = vmul.f32 0.6931472, %v2019_v16  ;;  %v1405_v16 = vrot.slane %v2918_v14, %v2889_v6 }
  0xff   :  { %v2023_v40 = vpop.eup %2022  ;;  %v993_v26 = vmul.f32 0.6931472, %v2021_v37 }
 0x100   :  { %v990_v42 = vsel %vm3000_vm8, %v987_v60, %v984_v35  ;;  %v1002_v53 = vmul.f32 0.6931472, %v2023_v40  ;;  %v1409_v60 = vrot.slane %v2918_v14, %v2893_v30 }
 0x101   :  { %v2025_v37 = vpop.eup %2024  ;;  %v999_v52 = vsel %vm3004_vm9, %v996_v21, %v993_v26  ;;  %v1018_v62 = vadd.f32 %v990_v42, %v954_v59  ;;  %v1417_v26 = vrot.slane %v2918_v14, %v2897_v56  ;;  %v3823_v42 = vrot.slane %v2910_v23, %v2889_v6 }
 0x102   :  { %v1008_v39 = vsel %vm3008_vm10, %v1005_v54, %v1002_v53  ;;  %v1011_v40 = vmul.f32 0.6931472, %v2025_v37  ;;  %v1019_v35 = vadd.f32 %v999_v52, %v955_v1  ;;  %v3817_v37 = vrot.slane %v2883_v57, %v2908_v20 }
 0x103   :  { %v1020_v21 = vadd.f32 %v1008_v39, %v956_v36  ;;  %v1022_v59 = vsel %vm958_vm11, %v2863_v47, %v1018_v62 }
 0x104   :  { %v1017_v1 = vsel %vm3022_vm13, %v1014_v48, %v1011_v40  ;;  %v1023_v54 = vsel %vm959_vm12, %v2865_v58, %v1019_v35  ;;  %v1026_v36 = vadd.f32 1e-05, %v1022_v59  ;;  %v3813_v40 = vrot.slane %v2883_v57, %v2897_v56 }
 0x105   :  { %v1021_v47 = vadd.f32 %v1017_v1, %v957_v9  ;;  %v1024_v62 = vsel %vm960_vm14, %v2867_v63, %v1020_v21  ;;  %v1027_v52 = vadd.f32 1e-05, %v1023_v54  ;;  %v3815_v63 = vrot.slane %v2883_v57, %v2900_v13 }
 0x106   :  { %v1028_v48 = vadd.f32 1e-05, %v1024_v62  ;;  %v1030_v53 = vmax.f32 %v1026_v36, 1e-05  ;;  %v3805_v36 = vrot.slane %v2880_v2, %v2916_v15  ;;  %v3819_v58 = vrot.slane %v2883_v57, %v2914_v11 }
 0x107   :  { %v1025_v9 = vsel %vm961_vm15, %v2869_v27, %v1021_v47  ;;  %v1031_v39 = vmax.f32 %v1027_v52, 1e-05  ;;  %v1696_v27 = vsel %vm1694_vm0, %v1049_v43, %v1213_v24  ;;  %v1699_v43 = vsel %vm1694_vm0, %v1061_v32, %v1225_v0 }
 0x108   :  { %v1029_v35 = vadd.f32 1e-05, %v1025_v9  ;;  %v1032_v21 = vmax.f32 %v1028_v48, 1e-05  ;;  %v3138_v59 = vmin.f32 %v1030_v53, 2.0  ;;  %v1695_v9 = vsel %vm1694_vm0, %v1045_v25, %v1209_v38 }
 0x109   :  { %v3142_v54 = vmin.f32 %v1031_v39, 2.0  ;;  %v1698_v25 = vsel %vm1694_vm0, %v1057_v7, %v1221_v31  ;;  %v1701_v7 = vsel %vm1694_vm0, %v1069_v34, %v1233_v41  ;;  %v3776_v32 = vrot.slane %v2764_v17, %v2916_v15 }
 0x10a   :  { %v1033_v62 = vmax.f32 %v1029_v35, 1e-05  ;;  %v3150_v52 = vmin.f32 %v1032_v21, 2.0  ;;  %v3777_v0 = vrot.slane %v2875_v55, %v2889_v6  ;;  %v3779_v34 = vrot.slane %v2769_v4, %v2893_v30 }
 0x10b   :  { %v1702_v31 = vsel %vm1694_vm0, %v3776_v32, %v1237_v18  ;;  %v3780_v17 = vrot.slane %v2769_v4, %v2895_v61  ;;  %v3781_v41 = vrot.slane %v2875_v55, %v2897_v56  ;;  %v3782_v38 = vrot.slane %v2769_v4, %v2897_v56 }
 0x10c   :  { %v3164_v21 = vmin.f32 %v1033_v62, 2.0  ;;  %v1697_v62 = vsel %vm1694_vm0, %v1053_v19, %v1217_v8  ;;  %v1700_v19 = vsel %vm1694_vm0, %v1065_v33, %v1229_v44  ;;  %v3778_v33 = vrot.slane %v2769_v4, %v2889_v6 }
 0x10d   :  { %v1704_v45 = vsel %vm1694_vm0, %v3779_v34, %v1245_v29  ;;  %v1705_v18 = vsel %vm1694_vm0, %v3780_v17, %v1249_v46  ;;  %v1706_v24 = vsel %vm1694_vm0, %v3782_v38, %v3781_v41  ;;  %v3783_v8 = vrot.slane %v2875_v55, %v2900_v13 }
 0x10e   :  { %v1703_v44 = vsel %vm1694_vm0, %v3778_v33, %v3777_v0  ;;  %v3784_v29 = vrot.slane %v2769_v4, %v2900_v13  ;;  %v3785_v0 = vrot.slane %v2875_v55, %v2908_v20  ;;  %v3786_v46 = vrot.slane %v2769_v4, %v2908_v20 }
 0x10f   :  { %v3787_v34 = vrot.slane %v2875_v55, %v2914_v11  ;;  %v3788_v17 = vrot.slane %v2769_v4, %v2914_v11  ;;  %v3789_v38 = vrot.slane %v2875_v55, %v2916_v15  ;;  %v3791_v35 = vrot.slane %v2880_v2, %v2889_v6 }
 0x110   :  { %v1707_v32 = vsel %vm1694_vm0, %v3784_v29, %v3783_v8  ;;  %v1708_v33 = vsel %vm1694_vm0, %v3786_v46, %v3785_v0  ;;  %v3790_v8 = vrot.slane %v2769_v4, %v2916_v15  ;;  %v3792_v0 = vrot.slane %v2772_v5, %v2889_v6 }
 0x111   :  { %v1709_v41 = vsel %vm1694_vm0, %v3788_v17, %v3787_v34  ;;  %v3793_v39 = vrot.slane %v2880_v2, %v2893_v30  ;;  %v3794_v34 = vrot.slane %v2772_v5, %v2893_v30  ;;  %v3795_v4 = vrot.slane %v2880_v2, %v2895_v61 }
 0x112   :  { %v1710_v29 = vsel %vm1694_vm0, %v3790_v8, %v3789_v38  ;;  %v1711_v46 = vsel %vm1694_vm0, %v3792_v0, %v3791_v35  ;;  %v3796_v17 = vrot.slane %v2772_v5, %v2895_v61  ;;  %v3797_v8 = vrot.slane %v2880_v2, %v2897_v56 }
 0x113   :  { %v1712_v55 = vsel %vm1694_vm0, %v3794_v34, %v3793_v39  ;;  %v3798_v35 = vrot.slane %v2772_v5, %v2897_v56  ;;  %v3799_v53 = vrot.slane %v2880_v2, %v2900_v13  ;;  %v3800_v39 = vrot.slane %v2772_v5, %v2900_v13 }
 0x114   :  { %v1713_v38 = vsel %vm1694_vm0, %v3796_v17, %v3795_v4  ;;  %v3801_v48 = vrot.slane %v2880_v2, %v2908_v20  ;;  %v3802_v4 = vrot.slane %v2772_v5, %v2908_v20  ;;  %v3803_v47 = vrot.slane %v2880_v2, %v2914_v11 }
 0x115   :  { %v1714_v0 = vsel %vm1694_vm0, %v3798_v35, %v3797_v8  ;;  %v1715_v34 = vsel %vm1694_vm0, %v3800_v39, %v3799_v53  ;;  %v3804_v8 = vrot.slane %v2772_v5, %v2914_v11  ;;  %v3806_v53 = vrot.slane %v2772_v5, %v2916_v15 }
 0x116   :  { %v1716_v17 = vsel %vm1694_vm0, %v3802_v4, %v3801_v48  ;;  %v3807_v48 = vrot.slane %v2883_v57, %v2889_v6  ;;  %v3808_v4 = vrot.slane %v2861_v10, %v2889_v6  ;;  %v3810_v2 = vrot.slane %v2861_v10, %v2893_v30 }
 0x117   :  { %v1717_v35 = vsel %vm1694_vm0, %v3804_v8, %v3803_v47  ;;  %v1718_v39 = vsel %vm1694_vm0, %v3806_v53, %v3805_v36  ;;  %v3809_v47 = vrot.slane %v2883_v57, %v2893_v30  ;;  %v3811_v5 = vrot.slane %v2883_v57, %v2895_v61 }
 0x118   :  { %v1719_v1 = vsel %vm1694_vm0, %v3808_v4, %v3807_v48  ;;  %v3812_v36 = vrot.slane %v2861_v10, %v2895_v61  ;;  %v3814_v48 = vrot.slane %v2861_v10, %v2897_v56 }
 0x119   :  { %v1720_v8 = vsel %vm1694_vm0, %v3810_v2, %v3809_v47  ;;  %v3816_v47 = vrot.slane %v2861_v10, %v2900_v13 }
 0x11a   :  { %v1721_v53 = vsel %vm1694_vm0, %v3812_v36, %v3811_v5  ;;  %v1722_v4 = vsel %vm1694_vm0, %v3814_v48, %v3813_v40  ;;  %v3818_v5 = vrot.slane %v2861_v10, %v2908_v20  ;;  %v3820_v40 = vrot.slane %v2861_v10, %v2914_v11 }
 0x11b   :  { %v1723_v2 = vsel %vm1694_vm0, %v3816_v47, %v3815_v63  ;;  %v3822_v63 = vrot.slane %v2861_v10, %v2916_v15  ;;  %v3826_v10 = vrot.slane %v2910_v23, %v2897_v56 }
 0x11c   :  { %v1724_v36 = vsel %vm1694_vm0, %v3818_v5, %v3817_v37  ;;  %v1725_v48 = vsel %vm1694_vm0, %v3820_v40, %v3819_v58  ;;  %v1728_v37 = vsel %vm1727_vm1, %v1695_v9, %v3823_v42  ;;  %v3824_v5 = vrot.slane %v2910_v23, %v2893_v30 }
 0x11d   :  { %v1726_v47 = vsel %vm1694_vm0, %v3822_v63, %v3821_v50  ;;  %v3825_v58 = vrot.slane %v2910_v23, %v2895_v61  ;;  %v1731_v50 = vsel %vm1727_vm1, %v1698_v25, %v3826_v10  ;;  %v3827_v40 = vrot.slane %v2910_v23, %v2900_v13 }
 0x11e   :  { %v1729_v3 = vsel %vm1727_vm1, %v1696_v27, %v3824_v5  ;;  %v3828_v9 = vrot.slane %v2910_v23, %v2908_v20  ;;  %v1735_v25 = vsel %vm1727_vm1, %v1702_v31, %v1401_v28  ;;  %v1739_v23 = vsel %vm1727_vm1, %v1706_v24, %v1417_v26 }
 0x11f   :  { %v1730_v57 = vsel %vm1727_vm1, %v1697_v62, %v3825_v58  ;;  %v1732_v42 = vsel %vm1727_vm1, %v1699_v43, %v3827_v40  ;;  %v1734_v62 = vsel %vm1727_vm1, %v1701_v7, %v1397_v51  ;;  %v1736_v43 = vsel %vm1727_vm1, %v1703_v44, %v1405_v16 }
 0x120   :  { %v1733_v27 = vsel %vm1727_vm1, %v1700_v19, %v3828_v9  ;;  %v1737_v19 = vsel %vm1727_vm1, %v1704_v45, %v1409_v60  ;;  %v1738_v51 = vsel %vm1727_vm1, %v1705_v18, %v1413_v22  ;;  %v3829_v28 = vrot.slane %v2918_v14, %v2900_v13 }
 0x121   :  { %v3830_v7 = vrot.slane %v2918_v14, %v2908_v20  ;;  %v3831_v31 = vrot.slane %v2918_v14, %v2914_v11  ;;  %v3832_v44 = vrot.slane %v2918_v14, %v2916_v15  ;;  %v3833_v45 = vrot.slane %v2926_v49, %v2889_v6 }
 0x122   :  { %v1740_v16 = vsel %vm1727_vm1, %v1707_v32, %v3829_v28  ;;  %v3834_v24 = vrot.slane %v2926_v49, %v2893_v30  ;;  %v3836_v14 = vrot.slane %v2926_v49, %v2897_v56  ;;  %v3837_v63 = vrot.slane %v2926_v49, %v2900_v13 }
 0x123   :  { %v1741_v60 = vsel %vm1727_vm1, %v1708_v33, %v3830_v7  ;;  %v1742_v22 = vsel %vm1727_vm1, %v1709_v41, %v3831_v31  ;;  %v1743_v26 = vsel %vm1727_vm1, %v1710_v29, %v3832_v44  ;;  %v1744_v18 = vsel %vm1727_vm1, %v1711_v46, %v3833_v45 }
 0x124   :  { %v1745_v32 = vsel %vm1727_vm1, %v1712_v55, %v3834_v24  ;;  %v3835_v33 = vrot.slane %v2926_v49, %v2895_v61  ;;  %v1747_v29 = vsel %vm1727_vm1, %v1714_v0, %v3836_v14  ;;  %v1748_v46 = vsel %vm1727_vm1, %v1715_v34, %v3837_v63 }
 0x125   :  { %v3838_v5 = vrot.slane %v2926_v49, %v2908_v20  ;;  %v3839_v58 = vrot.slane %v2926_v49, %v2914_v11  ;;  %v3840_v10 = vrot.slane %v2926_v49, %v2916_v15  ;;  %v3841_v40 = vrot.slane %v2934_v12, %v2889_v6 }
 0x126   :  { %v1746_v41 = vsel %vm1727_vm1, %v1713_v38, %v3835_v33  ;;  %v3842_v9 = vrot.slane %v2934_v12, %v2893_v30  ;;  %v3843_v28 = vrot.slane %v2934_v12, %v2895_v61  ;;  %v3844_v49 = vrot.slane %v2934_v12, %v2897_v56 }
 0x127   :  { %v1749_v55 = vsel %vm1727_vm1, %v1716_v17, %v3838_v5  ;;  %v1750_v38 = vsel %vm1727_vm1, %v1717_v35, %v3839_v58  ;;  %v1751_v0 = vsel %vm1727_vm1, %v1718_v39, %v3840_v10  ;;  %v1752_v34 = vsel %vm1727_vm1, %v1719_v1, %v3841_v40 }
 0x128   :  { %v1753_v17 = vsel %vm1727_vm1, %v1720_v8, %v3842_v9  ;;  %v1754_v35 = vsel %vm1727_vm1, %v1721_v53, %v3843_v28  ;;  %v1755_v39 = vsel %vm1727_vm1, %v1722_v4, %v3844_v49  ;;  %v3845_v7 = vrot.slane %v2934_v12, %v2900_v13 }
 0x129   :  { %v3846_v31 = vrot.slane %v2934_v12, %v2908_v20  ;;  %v3847_v44 = vrot.slane %v2934_v12, %v2914_v11  ;;  %v3848_v45 = vrot.slane %v2934_v12, %v2916_v15  ;;  %v3849_v24 = vrot.slane %v3138_v59, %v2889_v6 }
 0x12a   :  { %v1756_v1 = vsel %vm1727_vm1, %v1723_v2, %v3845_v7  ;;  %v3850_v33 = vrot.slane %v3138_v59, %v2893_v30  ;;  %v3851_v14 = vrot.slane %v3138_v59, %v2895_v61  ;;  %v3852_v12 = vrot.slane %v3138_v59, %v2897_v56 }
 0x12b   :  { %v1757_v8 = vsel %vm1727_vm1, %v1724_v36, %v3846_v31  ;;  %v1758_v53 = vsel %vm1727_vm1, %v1725_v48, %v3847_v44  ;;  %v1759_v4 = vsel %vm1727_vm1, %v1726_v47, %v3848_v45  ;;  %v1761_v2 = vsel %vm1760_vm2, %v1728_v37, %v3849_v24 }
 0x12c   :  { %v1762_v36 = vsel %vm1760_vm2, %v1729_v3, %v3850_v33  ;;  %v1763_v48 = vsel %vm1760_vm2, %v1730_v57, %v3851_v14  ;;  %v1764_v47 = vsel %vm1760_vm2, %v1731_v50, %v3852_v12  ;;  %v3853_v63 = vrot.slane %v3138_v59, %v2900_v13 }
 0x12d   :  { %v3854_v5 = vrot.slane %v3138_v59, %v2908_v20  ;;  %v3855_v58 = vrot.slane %v3138_v59, %v2914_v11  ;;  %v3856_v10 = vrot.slane %v3138_v59, %v2916_v15  ;;  %v3857_v40 = vrot.slane %v3142_v54, %v2889_v6 }
 0x12e   :  { %v1765_v37 = vsel %vm1760_vm2, %v1732_v42, %v3853_v63  ;;  %v3858_v9 = vrot.slane %v3142_v54, %v2893_v30  ;;  %v3859_v28 = vrot.slane %v3142_v54, %v2895_v61  ;;  %v3860_v59 = vrot.slane %v3142_v54, %v2897_v56 }
 0x12f   :  { %v1766_v3 = vsel %vm1760_vm2, %v1733_v27, %v3854_v5  ;;  %v1767_v57 = vsel %vm1760_vm2, %v1734_v62, %v3855_v58  ;;  %v1768_v50 = vsel %vm1760_vm2, %v1735_v25, %v3856_v10  ;;  %v1769_v42 = vsel %vm1760_vm2, %v1736_v43, %v3857_v40 }
 0x130   :  { %v1770_v27 = vsel %vm1760_vm2, %v1737_v19, %v3858_v9  ;;  %v1771_v62 = vsel %vm1760_vm2, %v1738_v51, %v3859_v28  ;;  %v1772_v25 = vsel %vm1760_vm2, %v1739_v23, %v3860_v59  ;;  %v3861_v49 = vrot.slane %v3142_v54, %v2900_v13 }
 0x131   :  { %v3862_v7 = vrot.slane %v3142_v54, %v2908_v20  ;;  %v3863_v31 = vrot.slane %v3142_v54, %v2914_v11  ;;  %v3864_v44 = vrot.slane %v3142_v54, %v2916_v15  ;;  %v3865_v45 = vrot.slane %v3150_v52, %v2889_v6 }
 0x132   :  { %v1773_v43 = vsel %vm1760_vm2, %v1740_v16, %v3861_v49  ;;  %v3866_v24 = vrot.slane %v3150_v52, %v2893_v30  ;;  %v3867_v33 = vrot.slane %v3150_v52, %v2895_v61  ;;  %v3868_v54 = vrot.slane %v3150_v52, %v2897_v56 }
 0x133   :  { %v1774_v19 = vsel %vm1760_vm2, %v1741_v60, %v3862_v7  ;;  %v1775_v51 = vsel %vm1760_vm2, %v1742_v22, %v3863_v31  ;;  %v1776_v23 = vsel %vm1760_vm2, %v1743_v26, %v3864_v44  ;;  %v1777_v16 = vsel %vm1760_vm2, %v1744_v18, %v3865_v45 }
 0x134   :  { %v1778_v60 = vsel %vm1760_vm2, %v1745_v32, %v3866_v24  ;;  %v1779_v22 = vsel %vm1760_vm2, %v1746_v41, %v3867_v33  ;;  %v1780_v26 = vsel %vm1760_vm2, %v1747_v29, %v3868_v54  ;;  %v3869_v14 = vrot.slane %v3150_v52, %v2900_v13 }
 0x135   :  { %v3870_v12 = vrot.slane %v3150_v52, %v2908_v20  ;;  %v3871_v63 = vrot.slane %v3150_v52, %v2914_v11  ;;  %v3872_v5 = vrot.slane %v3150_v52, %v2916_v15  ;;  %v3873_v58 = vrot.slane %v3164_v21, %v2889_v6 }
 0x136   :  { %v1781_v18 = vsel %vm1760_vm2, %v1748_v46, %v3869_v14  ;;  %v3874_v10 = vrot.slane %v3164_v21, %v2893_v30  ;;  %v3875_v40 = vrot.slane %v3164_v21, %v2895_v61  ;;  %v3876_v52 = vrot.slane %v3164_v21, %v2897_v56 }
 0x137   :  { %v1782_v32 = vsel %vm1760_vm2, %v1749_v55, %v3870_v12  ;;  %v1783_v41 = vsel %vm1760_vm2, %v1750_v38, %v3871_v63  ;;  %v1784_v29 = vsel %vm1760_vm2, %v1751_v0, %v3872_v5  ;;  %v1785_v46 = vsel %vm1760_vm2, %v1752_v34, %v3873_v58 }
 0x138   :  { %v1786_v55 = vsel %vm1760_vm2, %v1753_v17, %v3874_v10  ;;  %v1787_v38 = vsel %vm1760_vm2, %v1754_v35, %v3875_v40  ;;  %v1788_v0 = vsel %vm1760_vm2, %v1755_v39, %v3876_v52  ;;  %v3877_v6 = vrot.slane %v3164_v21, %v2900_v13 }
 0x139   :  { %v3878_v30 = vrot.slane %v3164_v21, %v2908_v20  ;;  %v3879_v61 = vrot.slane %v3164_v21, %v2914_v11  ;;  %v3880_v56 = vrot.slane %v3164_v21, %v2916_v15  ;;  %v1825_v9 = vcombine.low %v1761_v2, %v1762_v36 }
 0x13a   :  { %v1789_v34 = vsel %vm1760_vm2, %v1756_v1, %v3877_v6  ;;  %v1826_v28 = vcombine.low %v1763_v48, %v1764_v47  ;;  %v1827_v13 = vcombine.low %v1765_v37, %v1766_v3  ;;  %v1828_v59 = vcombine.low %v1767_v57, %v1768_v50 }
 0x13b   :  { %v1790_v17 = vsel %vm1760_vm2, %v1757_v8, %v3878_v30  ;;  %v1791_v35 = vsel %vm1760_vm2, %v1758_v53, %v3879_v61  ;;  %v1792_v39 = vsel %vm1760_vm2, %v1759_v4, %v3880_v56  ;;  %v1829_v1 = vcombine.low %v1769_v42, %v1770_v27  ;;  %1857 = vst [vmem:[%s3767_s3] sm:$0xff] %v1825_v9 }
 0x13c   :  { %v1830_v49 = vcombine.low %v1771_v62, %v1772_v25  ;;  %v1831_v7 = vcombine.low %v1773_v43, %v1774_v19  ;;  %v1832_v20 = vcombine.low %v1775_v51, %v1776_v23  ;;  %v1833_v31 = vcombine.low %v1777_v16, %v1778_v60  ;;  %1858 = vst [vmem:[%s3767_s3 + $0x8] sm:$0xff] %v1826_v28 }
 0x13d   :  { %v1834_v8 = vcombine.low %v1779_v22, %v1780_v26  ;;  %v1835_v44 = vcombine.low %v1781_v18, %v1782_v32  ;;  %v1836_v45 = vcombine.low %v1783_v41, %v1784_v29  ;;  %1859 = vst [vmem:[%s3767_s3 + $0x10] sm:$0xff] %v1827_v13  ;;  %1860 = vst [vmem:[%s3767_s3 + $0x18] sm:$0xff] %v1828_v59 }
 0x13e   :  { %v1837_v11 = vcombine.low %v1785_v46, %v1786_v55  ;;  %v1838_v15 = vcombine.low %v1787_v38, %v1788_v0  ;;  %v1839_v21 = vcombine.low %v1789_v34, %v1790_v17  ;;  %v1840_v53 = vcombine.low %v1791_v35, %v1792_v39  ;;  %1861 = vst [vmem:[%s3767_s3 + $0x20] sm:$0xff] %v1829_v1 }
 0x13f   :  { %1862 = vst [vmem:[%s3767_s3 + $0x28] sm:$0xff] %v1830_v49  ;;  %1863 = vst [vmem:[%s3767_s3 + $0x30] sm:$0xff] %v1831_v7 }
 0x140   :  { %1864 = vst [vmem:[%s3767_s3 + $0x38] sm:$0xff] %v1832_v20  ;;  %1865 = vst [vmem:[%s3767_s3 + $0x40] sm:$0xff] %v1833_v31 }
 0x141   :  { %1866 = vst [vmem:[%s3767_s3 + $0x48] sm:$0xff] %v1834_v8  ;;  %1867 = vst [vmem:[%s3767_s3 + $0x50] sm:$0xff] %v1835_v44 }
 0x142   :  { %1868 = vst [vmem:[%s3767_s3 + $0x58] sm:$0xff] %v1836_v45  ;;  %1869 = vst [vmem:[%s3767_s3 + $0x60] sm:$0xff] %v1837_v11 }
 0x143   :  { %1870 = vst [vmem:[%s3767_s3 + $0x68] sm:$0xff] %v1838_v15  ;;  %1871 = vst [vmem:[%s3767_s3 + $0x70] sm:$0xff] %v1839_v21 }
 0x144   :  { %1872 = vst [vmem:[%s3767_s3 + $0x78] sm:$0xff] %v1840_v53 }

</bundles_post_ra>
